<compile_context>
chip_gen: v6e
topology: v6e:2x2x1
jax: 0.10.0
libtpu: 0.0.40
codegen_flags: <defaults>
</compile_context>

<pallas_src>
import functools

import jax
import jax.numpy as jnp
from jax.experimental import pallas as pl
from jax.experimental.pallas import tpu as pltpu


def _round_up(x, m):
    return ((x + m - 1) // m) * m


# ----------------------------------------------------------------------------
# Fused Block kernel: conv(k,'same') + ReLU -> conv(k,'same') + ReLU
# ----------------------------------------------------------------------------
def _block_kernel(x_ref, w1_ref, b1_ref, w2_ref, b2_ref, mask_ref, o_ref,
                  h1_ref, *, k, wp, mp, padl, pad_amt):
    """One batch element of a UNet Block, fully fused.

    Layout: channels in sublanes, flattened padded-width spatial grid in lanes
    (q = h*Wp + w), so outputs are lane-dense over M = H*Wp.

    x_ref   : (1, Cin, L1)          bf16  zero-padded, flattened NCHW input
    w1_ref  : (k*k, Cmid, Cin)      bf16  conv1 weights, one (Cmid,Cin) slab/tap
    b1_ref  : (Cmid, 1)             f32
    w2_ref  : (k*k, Cout, Cmid)     f32   conv2 weights per tap (VMEM resident)
    b2_ref  : (Cout, 1)             f32
    mask_ref: (1, mp)               f32   1.0 on valid columns of the Wp grid
    o_ref   : (1, Cout, mp)         f32   conv2 output on the Wp grid
    h1_ref  : (Cmid, padl+mp+pad)   f32   VMEM scratch: re-padded conv1 act.
    """
    cmid = w1_ref.shape[1]
    cout = w2_ref.shape[1]

    # ---- conv1 + bias + ReLU: accumulate k*k shifted (Cmid,Cin)@(Cin,M) dots.
    acc1 = jnp.zeros((cmid, mp), jnp.float32)
    for di in range(k):
        for dj in range(k):
            off = di * wp + dj
            xs = x_ref[0, :, off:off + mp]                       # (Cin, mp) bf16
            acc1 = acc1 + jnp.dot(w1_ref[di * k + dj], xs,
                                  preferred_element_type=jnp.float32)
    # zero the junk columns (w in [W, Wp)) so they act as conv2's zero padding
    h1 = jnp.maximum(acc1 + b1_ref[...], 0.0) * mask_ref[...]    # (Cmid, mp) f32

    # ---- place conv1 activation with zero margins in VMEM (no HBM round trip)
    h1_ref[...] = jnp.zeros_like(h1_ref)
    h1_ref[:, padl:padl + mp] = h1

    # ---- conv2 + bias + ReLU: same tap accumulation over the padded buffer.
    base = padl - pad_amt
    acc2 = jnp.zeros((cout, mp), jnp.float32)
    for di in range(k):
        for dj in range(k):
            off = base + di * wp + dj
            hs = h1_ref[:, off:off + mp]                         # (Cmid, mp) f32
            acc2 = acc2 + jnp.dot(w2_ref[di * k + dj], hs,
                                  preferred_element_type=jnp.float32)
    o_ref[0] = jnp.maximum(acc2 + b2_ref[...], 0.0).astype(o_ref.dtype)


# ----------------------------------------------------------------------------
# Wrappers
# ----------------------------------------------------------------------------
def block_forward(x_nchw, w1_taps, b1, w2_taps, b2, k):
    """Fused Block (conv+ReLU+conv+ReLU), NCHW in -> NCHW out, via one kernel."""
    n, cin, h, w = x_nchw.shape
    cmid = w1_taps.shape[1]
    cout = w2_taps.shape[1]
    p = k // 2                                   # 'same' padding for odd k
    hp, wp = h + 2 * p, w + 2 * p
    mp = h * wp                                  # output positions on Wp grid
    pad_amt = p * wp + p
    padl = _round_up(pad_amt, 128)               # aligned left margin in scratch
    total = _round_up(padl + mp + pad_amt, 128)  # scratch lane extent
    l1 = _round_up(hp * wp + (k - 1), 128)       # flat input extent (tap slices stay in bounds)

    # Zero 'same'-pad, flatten spatially, pad tail.  This replaces im2col: the
    # input is read once and the k*k taps are contiguous shifted slices inside
    # the kernel.  bf16 halves HBM bytes on this dominant stream.
    xp = jnp.pad(x_nchw, ((0, 0), (0, 0), (p, p), (p, p)))
    xf = xp.reshape(n, cin, hp * wp)
    xf = jnp.pad(xf, ((0, 0), (0, 0), (0, l1 - hp * wp))).astype(jnp.bfloat16)

    # Valid-column mask on the Wp grid (junk cols must be exactly zero so they
    # serve as conv2's left/right zero padding).
    mask = ((jnp.arange(mp, dtype=jnp.int32) % wp) < w).astype(jnp.float32)
    mask = mask.reshape(1, mp)

    kernel = functools.partial(_block_kernel, k=k, wp=wp, mp=mp,
                               padl=padl, pad_amt=pad_amt)

    flops = 2 * n * mp * k * k * (cin * cmid + cmid * cout)
    bytes_accessed = (xf.size * 2 + w1_taps.size * 2 + w2_taps.size * 4
                      + (b1.size + b2.size + mask.size) * 4
                      + n * cout * mp * 4)

    # NOTE on scaling: for real UNet resolutions, tile the flat M axis here
    # (row tiles with a (k-1)-row halo on the x slices) and add that axis to
    # the grid (also "parallel") so both megacore sharding and double-buffered
    # pipelining have enough steps; re-derive the tile for 64 MiB VMEM on v7x.
    out = pl.pallas_call(
        kernel,
        out_shape=jax.ShapeDtypeStruct((n, cout, mp), jnp.float32),
        grid=(n,),
        in_specs=[
            pl.BlockSpec((1, cin, l1), lambda b: (b, 0, 0)),
            pl.BlockSpec((k * k, cmid, cin), lambda b: (0, 0, 0)),
            pl.BlockSpec((cmid, 1), lambda b: (0, 0)),
            pl.BlockSpec((k * k, cout, cmid), lambda b: (0, 0, 0)),
            pl.BlockSpec((cout, 1), lambda b: (0, 0)),
            pl.BlockSpec((1, mp), lambda b: (0, 0)),
        ],
        out_specs=pl.BlockSpec((1, cout, mp), lambda b: (b, 0, 0)),
        scratch_shapes=[pltpu.VMEM((cmid, total), jnp.float32)],
        compiler_params=pltpu.CompilerParams(dimension_semantics=("parallel",)),
        cost_estimate=pl.CostEstimate(flops=flops, transcendentals=0,
                                      bytes_accessed=bytes_accessed),
    )(xf, w1_taps, b1.reshape(cmid, 1), w2_taps, b2.reshape(cout, 1), mask)

    # Drop the junk columns: (N, Cout, H*Wp) -> (N, Cout, H, W) == NCHW already.
    return out.reshape(n, cout, h, wp)[:, :, :, :w]


def maxpool2d_nchw(x, pool_k, stride):
    """MaxPool2d(kernel_size, stride), ceil_mode=False, as cheap glue (no 4x stack)."""
    n, c, h, w = x.shape
    if pool_k == stride and h % stride == 0 and w % stride == 0:
        return x.reshape(n, c, h // stride, stride, w // stride, stride).max(axis=(3, 5))
    oh = (h - pool_k) // stride + 1
    ow = (w - pool_k) // stride + 1
    out = None
    for i in range(pool_k):
        for j in range(pool_k):
            win = x[:, :, i:i + (oh - 1) * stride + 1:stride,
                         j:j + (ow - 1) * stride + 1:stride]
            out = win if out is None else jnp.maximum(out, win)
    return out


# ----------------------------------------------------------------------------
# Encoder (Block = conv->relu->conv->relu ; Encoder = blocks with maxpool between)
# ----------------------------------------------------------------------------
class EncoderPallas:
    def __init__(self, key, channel_sizes, block_kernel_size,
                 maxpool_kernel_size, stride):
        self.k = block_kernel_size
        self.pool_k = maxpool_kernel_size
        self.pool_s = stride
        self.params = []
        for i in range(len(channel_sizes) - 1):
            cin, cout = channel_sizes[i], channel_sizes[i + 1]
            key, k1, k2, k3, k4 = jax.random.split(key, 5)
            w1 = 0.1 * jax.random.normal(k1, (cout, cin, self.k, self.k), jnp.float32)
            b1 = 0.1 * jax.random.normal(k2, (cout,), jnp.float32)
            w2 = 0.1 * jax.random.normal(k3, (cout, cout, self.k, self.k), jnp.float32)
            b2 = 0.1 * jax.random.normal(k4, (cout,), jnp.float32)
            # Per-tap weight slabs (k*k, Cout, Cin).  conv1 weights in bf16 to
            # match the bf16 activation stream on the MXU; conv2 weights stay
            # f32 (tiny, VMEM-resident, better numerics for the 2nd matmul).
            w1_t = jnp.transpose(w1, (2, 3, 0, 1)).reshape(
                self.k * self.k, cout, cin).astype(jnp.bfloat16)
            w2_t = jnp.transpose(w2, (2, 3, 0, 1)).reshape(
                self.k * self.k, cout, cout)
            self.params.append((w1_t, b1, w2_t, b2))

    def __call__(self, x_nchw):
        feats = []
        feat = x_nchw
        n_blocks = len(self.params)
        for i, (w1, b1, w2, b2) in enumerate(self.params):
            feat = block_forward(feat, w1, b1, w2, b2, self.k)   # fused Block
            feats.append(feat)
            if i + 1 < n_blocks:
                # The pool after the last block never reaches the returned
                # values in the reference forward, so it is skipped.
                feat = maxpool2d_nchw(feat, self.pool_k, self.pool_s)
        return feats[-1], feats[:-1]


# ----------------------------------------------------------------------------
if __name__ == "__main__":
    key = jax.random.PRNGKey(0)
    key, pkey, xkey = jax.random.split(key, 3)

    # cfg: channel_sizes=[4, 8, 16], block_kernel_size=3,
    #      maxpool_kernel_size=2, stride=2
    encoder = EncoderPallas(pkey,
                            channel_sizes=[4, 8, 16],
                            block_kernel_size=3,
                            maxpool_kernel_size=2,
                            stride=2)

    x = jax.random.normal(xkey, (2, 4, 16, 16), jnp.float32)   # NCHW input

    last_feat, skip_feats = jax.jit(encoder.__call__)(x)
    jax.block_until_ready(last_feat)
    for f in skip_feats:
        jax.block_until_ready(f)

    assert last_feat.shape == (2, 16, 8, 8), last_feat.shape
    assert len(skip_feats) == 1 and skip_feats[0].shape == (2, 8, 16, 16), skip_feats[0].shape
    assert bool(jnp.all(jnp.isfinite(last_feat)))
    assert bool(jnp.all(last_feat >= 0.0))          # ReLU output
    print("KERNEL_OK")
</pallas_src>

<mosaic_0001>
module attributes {stable_mosaic.version = 11 : i64} {
  func.func @_block_kernel(%arg0: i32, %arg1: memref<1x4x384xbf16, #tpu.memory_space<vmem>>, %arg2: memref<9x8x4xbf16, #tpu.memory_space<vmem>>, %arg3: memref<8x1xf32, #tpu.memory_space<vmem>>, %arg4: memref<9x8x8xf32, #tpu.memory_space<vmem>>, %arg5: memref<8x1xf32, #tpu.memory_space<vmem>>, %arg6: memref<1x288xf32, #tpu.memory_space<vmem>>, %arg7: memref<1x8x288xf32, #tpu.memory_space<vmem>>, %arg8: memref<8x512xf32, #tpu.memory_space<vmem>>) attributes {dimension_semantics = [#tpu.dimension_semantics<parallel>], iteration_bounds = array<i64: 2>, scalar_prefetch = 0 : i64, scratch_operands = 1 : i64, tpu.core_type = #tpu.core_type<tc>, window_params = [{transform_indices = @transform_0, window_bounds = array<i64: 1, 4, 384>}, {pipeline_mode = #tpu.pipeline_mode<synchronous>, transform_indices = @transform_1, window_bounds = array<i64: 9, 8, 4>}, {pipeline_mode = #tpu.pipeline_mode<synchronous>, transform_indices = @transform_2, window_bounds = array<i64: 8, 1>}, {pipeline_mode = #tpu.pipeline_mode<synchronous>, transform_indices = @transform_3, window_bounds = array<i64: 9, 8, 8>}, {pipeline_mode = #tpu.pipeline_mode<synchronous>, transform_indices = @transform_4, window_bounds = array<i64: 8, 1>}, {pipeline_mode = #tpu.pipeline_mode<synchronous>, transform_indices = @transform_5, window_bounds = array<i64: 1, 288>}, {transform_indices = @transform_6, window_bounds = array<i64: 1, 8, 288>}]} {
    %cst = arith.constant 0.000000e+00 : f32
    %0 = vector.broadcast %cst : f32 to vector<8x288xf32>
    %c0 = arith.constant 0 : index
    %c0_0 = arith.constant 0 : index
    %c0_1 = arith.constant 0 : index
    %1 = vector.load %arg1[%c0, %c0_0, %c0_1] : memref<1x4x384xbf16, #tpu.memory_space<vmem>>, vector<1x4x288xbf16>
    %2 = vector.shape_cast %1 : vector<1x4x288xbf16> to vector<4x288xbf16>
    %c0_2 = arith.constant 0 : index
    %c0_3 = arith.constant 0 : index
    %c0_4 = arith.constant 0 : index
    %3 = vector.load %arg2[%c0_2, %c0_3, %c0_4] : memref<9x8x4xbf16, #tpu.memory_space<vmem>>, vector<1x8x4xbf16>
    %4 = vector.shape_cast %3 : vector<1x8x4xbf16> to vector<8x4xbf16>
    %cst_5 = arith.constant dense<0.000000e+00> : vector<8x288xf32>
    %5 = tpu.matmul %4, %2, %cst_5 {dimension_numbers = #tpu.dot_dimension_numbers<[1], [0], [0], [1], [0, 0, 1, 1], [], []>} : vector<8x4xbf16>, vector<4x288xbf16>, vector<8x288xf32> -> vector<8x288xf32>
    %6 = arith.addf %0, %5 : vector<8x288xf32>
    %c0_6 = arith.constant 0 : index
    %c0_7 = arith.constant 0 : index
    %c1 = arith.constant 1 : index
    %7 = vector.load %arg1[%c0_6, %c0_7, %c1] : memref<1x4x384xbf16, #tpu.memory_space<vmem>>, vector<1x4x288xbf16>
    %8 = vector.shape_cast %7 : vector<1x4x288xbf16> to vector<4x288xbf16>
    %c1_8 = arith.constant 1 : index
    %c0_9 = arith.constant 0 : index
    %c0_10 = arith.constant 0 : index
    %9 = vector.load %arg2[%c1_8, %c0_9, %c0_10] : memref<9x8x4xbf16, #tpu.memory_space<vmem>>, vector<1x8x4xbf16>
    %10 = vector.shape_cast %9 : vector<1x8x4xbf16> to vector<8x4xbf16>
    %cst_11 = arith.constant dense<0.000000e+00> : vector<8x288xf32>
    %11 = tpu.matmul %10, %8, %cst_11 {dimension_numbers = #tpu.dot_dimension_numbers<[1], [0], [0], [1], [0, 0, 1, 1], [], []>} : vector<8x4xbf16>, vector<4x288xbf16>, vector<8x288xf32> -> vector<8x288xf32>
    %12 = arith.addf %6, %11 : vector<8x288xf32>
    %c0_12 = arith.constant 0 : index
    %c0_13 = arith.constant 0 : index
    %c2 = arith.constant 2 : index
    %13 = vector.load %arg1[%c0_12, %c0_13, %c2] : memref<1x4x384xbf16, #tpu.memory_space<vmem>>, vector<1x4x288xbf16>
    %14 = vector.shape_cast %13 : vector<1x4x288xbf16> to vector<4x288xbf16>
    %c2_14 = arith.constant 2 : index
    %c0_15 = arith.constant 0 : index
    %c0_16 = arith.constant 0 : index
    %15 = vector.load %arg2[%c2_14, %c0_15, %c0_16] : memref<9x8x4xbf16, #tpu.memory_space<vmem>>, vector<1x8x4xbf16>
    %16 = vector.shape_cast %15 : vector<1x8x4xbf16> to vector<8x4xbf16>
    %cst_17 = arith.constant dense<0.000000e+00> : vector<8x288xf32>
    %17 = tpu.matmul %16, %14, %cst_17 {dimension_numbers = #tpu.dot_dimension_numbers<[1], [0], [0], [1], [0, 0, 1, 1], [], []>} : vector<8x4xbf16>, vector<4x288xbf16>, vector<8x288xf32> -> vector<8x288xf32>
    %18 = arith.addf %12, %17 : vector<8x288xf32>
    %c0_18 = arith.constant 0 : index
    %c0_19 = arith.constant 0 : index
    %c18 = arith.constant 18 : index
    %19 = vector.load %arg1[%c0_18, %c0_19, %c18] : memref<1x4x384xbf16, #tpu.memory_space<vmem>>, vector<1x4x288xbf16>
    %20 = vector.shape_cast %19 : vector<1x4x288xbf16> to vector<4x288xbf16>
    %c3 = arith.constant 3 : index
    %c0_20 = arith.constant 0 : index
    %c0_21 = arith.constant 0 : index
    %21 = vector.load %arg2[%c3, %c0_20, %c0_21] : memref<9x8x4xbf16, #tpu.memory_space<vmem>>, vector<1x8x4xbf16>
    %22 = vector.shape_cast %21 : vector<1x8x4xbf16> to vector<8x4xbf16>
    %cst_22 = arith.constant dense<0.000000e+00> : vector<8x288xf32>
    %23 = tpu.matmul %22, %20, %cst_22 {dimension_numbers = #tpu.dot_dimension_numbers<[1], [0], [0], [1], [0, 0, 1, 1], [], []>} : vector<8x4xbf16>, vector<4x288xbf16>, vector<8x288xf32> -> vector<8x288xf32>
    %24 = arith.addf %18, %23 : vector<8x288xf32>
    %c0_23 = arith.constant 0 : index
    %c0_24 = arith.constant 0 : index
    %c19 = arith.constant 19 : index
    %25 = vector.load %arg1[%c0_23, %c0_24, %c19] : memref<1x4x384xbf16, #tpu.memory_space<vmem>>, vector<1x4x288xbf16>
    %26 = vector.shape_cast %25 : vector<1x4x288xbf16> to vector<4x288xbf16>
    %c4 = arith.constant 4 : index
    %c0_25 = arith.constant 0 : index
    %c0_26 = arith.constant 0 : index
    %27 = vector.load %arg2[%c4, %c0_25, %c0_26] : memref<9x8x4xbf16, #tpu.memory_space<vmem>>, vector<1x8x4xbf16>
    %28 = vector.shape_cast %27 : vector<1x8x4xbf16> to vector<8x4xbf16>
    %cst_27 = arith.constant dense<0.000000e+00> : vector<8x288xf32>
    %29 = tpu.matmul %28, %26, %cst_27 {dimension_numbers = #tpu.dot_dimension_numbers<[1], [0], [0], [1], [0, 0, 1, 1], [], []>} : vector<8x4xbf16>, vector<4x288xbf16>, vector<8x288xf32> -> vector<8x288xf32>
    %30 = arith.addf %24, %29 : vector<8x288xf32>
    %c0_28 = arith.constant 0 : index
    %c0_29 = arith.constant 0 : index
    %c20 = arith.constant 20 : index
    %31 = vector.load %arg1[%c0_28, %c0_29, %c20] : memref<1x4x384xbf16, #tpu.memory_space<vmem>>, vector<1x4x288xbf16>
    %32 = vector.shape_cast %31 : vector<1x4x288xbf16> to vector<4x288xbf16>
    %c5 = arith.constant 5 : index
    %c0_30 = arith.constant 0 : index
    %c0_31 = arith.constant 0 : index
    %33 = vector.load %arg2[%c5, %c0_30, %c0_31] : memref<9x8x4xbf16, #tpu.memory_space<vmem>>, vector<1x8x4xbf16>
    %34 = vector.shape_cast %33 : vector<1x8x4xbf16> to vector<8x4xbf16>
    %cst_32 = arith.constant dense<0.000000e+00> : vector<8x288xf32>
    %35 = tpu.matmul %34, %32, %cst_32 {dimension_numbers = #tpu.dot_dimension_numbers<[1], [0], [0], [1], [0, 0, 1, 1], [], []>} : vector<8x4xbf16>, vector<4x288xbf16>, vector<8x288xf32> -> vector<8x288xf32>
    %36 = arith.addf %30, %35 : vector<8x288xf32>
    %c0_33 = arith.constant 0 : index
    %c0_34 = arith.constant 0 : index
    %c36 = arith.constant 36 : index
    %37 = vector.load %arg1[%c0_33, %c0_34, %c36] : memref<1x4x384xbf16, #tpu.memory_space<vmem>>, vector<1x4x288xbf16>
    %38 = vector.shape_cast %37 : vector<1x4x288xbf16> to vector<4x288xbf16>
    %c6 = arith.constant 6 : index
    %c0_35 = arith.constant 0 : index
    %c0_36 = arith.constant 0 : index
    %39 = vector.load %arg2[%c6, %c0_35, %c0_36] : memref<9x8x4xbf16, #tpu.memory_space<vmem>>, vector<1x8x4xbf16>
    %40 = vector.shape_cast %39 : vector<1x8x4xbf16> to vector<8x4xbf16>
    %cst_37 = arith.constant dense<0.000000e+00> : vector<8x288xf32>
    %41 = tpu.matmul %40, %38, %cst_37 {dimension_numbers = #tpu.dot_dimension_numbers<[1], [0], [0], [1], [0, 0, 1, 1], [], []>} : vector<8x4xbf16>, vector<4x288xbf16>, vector<8x288xf32> -> vector<8x288xf32>
    %42 = arith.addf %36, %41 : vector<8x288xf32>
    %c0_38 = arith.constant 0 : index
    %c0_39 = arith.constant 0 : index
    %c37 = arith.constant 37 : index
    %43 = vector.load %arg1[%c0_38, %c0_39, %c37] : memref<1x4x384xbf16, #tpu.memory_space<vmem>>, vector<1x4x288xbf16>
    %44 = vector.shape_cast %43 : vector<1x4x288xbf16> to vector<4x288xbf16>
    %c7 = arith.constant 7 : index
    %c0_40 = arith.constant 0 : index
    %c0_41 = arith.constant 0 : index
    %45 = vector.load %arg2[%c7, %c0_40, %c0_41] : memref<9x8x4xbf16, #tpu.memory_space<vmem>>, vector<1x8x4xbf16>
    %46 = vector.shape_cast %45 : vector<1x8x4xbf16> to vector<8x4xbf16>
    %cst_42 = arith.constant dense<0.000000e+00> : vector<8x288xf32>
    %47 = tpu.matmul %46, %44, %cst_42 {dimension_numbers = #tpu.dot_dimension_numbers<[1], [0], [0], [1], [0, 0, 1, 1], [], []>} : vector<8x4xbf16>, vector<4x288xbf16>, vector<8x288xf32> -> vector<8x288xf32>
    %48 = arith.addf %42, %47 : vector<8x288xf32>
    %c0_43 = arith.constant 0 : index
    %c0_44 = arith.constant 0 : index
    %c38 = arith.constant 38 : index
    %49 = vector.load %arg1[%c0_43, %c0_44, %c38] : memref<1x4x384xbf16, #tpu.memory_space<vmem>>, vector<1x4x288xbf16>
    %50 = vector.shape_cast %49 : vector<1x4x288xbf16> to vector<4x288xbf16>
    %c8 = arith.constant 8 : index
    %c0_45 = arith.constant 0 : index
    %c0_46 = arith.constant 0 : index
    %51 = vector.load %arg2[%c8, %c0_45, %c0_46] : memref<9x8x4xbf16, #tpu.memory_space<vmem>>, vector<1x8x4xbf16>
    %52 = vector.shape_cast %51 : vector<1x8x4xbf16> to vector<8x4xbf16>
    %cst_47 = arith.constant dense<0.000000e+00> : vector<8x288xf32>
    %53 = tpu.matmul %52, %50, %cst_47 {dimension_numbers = #tpu.dot_dimension_numbers<[1], [0], [0], [1], [0, 0, 1, 1], [], []>} : vector<8x4xbf16>, vector<4x288xbf16>, vector<8x288xf32> -> vector<8x288xf32>
    %54 = arith.addf %48, %53 : vector<8x288xf32>
    %c0_48 = arith.constant 0 : index
    %c0_49 = arith.constant 0 : index
    %55 = vector.load %arg3[%c0_48, %c0_49] : memref<8x1xf32, #tpu.memory_space<vmem>>, vector<8x1xf32>
    %56 = vector.broadcast %55 : vector<8x1xf32> to vector<8x288xf32>
    %57 = arith.addf %54, %56 : vector<8x288xf32>
    %cst_50 = arith.constant 0.000000e+00 : f32
    %58 = vector.broadcast %cst_50 : f32 to vector<8x288xf32>
    %59 = arith.maximumf %57, %58 : vector<8x288xf32>
    %c0_51 = arith.constant 0 : index
    %c0_52 = arith.constant 0 : index
    %60 = vector.load %arg6[%c0_51, %c0_52] : memref<1x288xf32, #tpu.memory_space<vmem>>, vector<1x288xf32>
    %61 = vector.broadcast %60 : vector<1x288xf32> to vector<8x288xf32>
    %62 = arith.mulf %59, %61 : vector<8x288xf32>
    %cst_53 = arith.constant 0.000000e+00 : f32
    %63 = vector.broadcast %cst_53 : f32 to vector<8x512xf32>
    %c0_54 = arith.constant 0 : index
    %c0_55 = arith.constant 0 : index
    %64 = vector.load %arg8[%c0_54, %c0_55] : memref<8x512xf32, #tpu.memory_space<vmem>>, vector<8x512xf32>
    tpu.vector_store %arg8[%c0_54, %c0_55], %63 {strides = array<i32>} : memref<8x512xf32, #tpu.memory_space<vmem>>, vector<8x512xf32>,
    %c0_56 = arith.constant 0 : index
    %c128 = arith.constant 128 : index
    %65 = vector.load %arg8[%c0_56, %c128] : memref<8x512xf32, #tpu.memory_space<vmem>>, vector<8x288xf32>
    tpu.vector_store %arg8[%c0_56, %c128], %62 {strides = array<i32>} : memref<8x512xf32, #tpu.memory_space<vmem>>, vector<8x288xf32>,
    %cst_57 = arith.constant 0.000000e+00 : f32
    %66 = vector.broadcast %cst_57 : f32 to vector<8x288xf32>
    %c0_58 = arith.constant 0 : index
    %c109 = arith.constant 109 : index
    %67 = vector.load %arg8[%c0_58, %c109] : memref<8x512xf32, #tpu.memory_space<vmem>>, vector<8x288xf32>
    %c0_59 = arith.constant 0 : index
    %c0_60 = arith.constant 0 : index
    %c0_61 = arith.constant 0 : index
    %68 = vector.load %arg4[%c0_59, %c0_60, %c0_61] : memref<9x8x8xf32, #tpu.memory_space<vmem>>, vector<1x8x8xf32>
    %69 = vector.shape_cast %68 : vector<1x8x8xf32> to vector<8x8xf32>
    %cst_62 = arith.constant dense<0.000000e+00> : vector<8x288xf32>
    %70 = tpu.matmul %69, %67, %cst_62 {dimension_numbers = #tpu.dot_dimension_numbers<[1], [0], [0], [1], [0, 0, 1, 1], [], []>} : vector<8x8xf32>, vector<8x288xf32>, vector<8x288xf32> -> vector<8x288xf32>
    %71 = arith.addf %66, %70 : vector<8x288xf32>
    %c0_63 = arith.constant 0 : index
    %c110 = arith.constant 110 : index
    %72 = vector.load %arg8[%c0_63, %c110] : memref<8x512xf32, #tpu.memory_space<vmem>>, vector<8x288xf32>
    %c1_64 = arith.constant 1 : index
    %c0_65 = arith.constant 0 : index
    %c0_66 = arith.constant 0 : index
    %73 = vector.load %arg4[%c1_64, %c0_65, %c0_66] : memref<9x8x8xf32, #tpu.memory_space<vmem>>, vector<1x8x8xf32>
    %74 = vector.shape_cast %73 : vector<1x8x8xf32> to vector<8x8xf32>
    %cst_67 = arith.constant dense<0.000000e+00> : vector<8x288xf32>
    %75 = tpu.matmul %74, %72, %cst_67 {dimension_numbers = #tpu.dot_dimension_numbers<[1], [0], [0], [1], [0, 0, 1, 1], [], []>} : vector<8x8xf32>, vector<8x288xf32>, vector<8x288xf32> -> vector<8x288xf32>
    %76 = arith.addf %71, %75 : vector<8x288xf32>
    %c0_68 = arith.constant 0 : index
    %c111 = arith.constant 111 : index
    %77 = vector.load %arg8[%c0_68, %c111] : memref<8x512xf32, #tpu.memory_space<vmem>>, vector<8x288xf32>
    %c2_69 = arith.constant 2 : index
    %c0_70 = arith.constant 0 : index
    %c0_71 = arith.constant 0 : index
    %78 = vector.load %arg4[%c2_69, %c0_70, %c0_71] : memref<9x8x8xf32, #tpu.memory_space<vmem>>, vector<1x8x8xf32>
    %79 = vector.shape_cast %78 : vector<1x8x8xf32> to vector<8x8xf32>
    %cst_72 = arith.constant dense<0.000000e+00> : vector<8x288xf32>
    %80 = tpu.matmul %79, %77, %cst_72 {dimension_numbers = #tpu.dot_dimension_numbers<[1], [0], [0], [1], [0, 0, 1, 1], [], []>} : vector<8x8xf32>, vector<8x288xf32>, vector<8x288xf32> -> vector<8x288xf32>
    %81 = arith.addf %76, %80 : vector<8x288xf32>
    %c0_73 = arith.constant 0 : index
    %c127 = arith.constant 127 : index
    %82 = vector.load %arg8[%c0_73, %c127] : memref<8x512xf32, #tpu.memory_space<vmem>>, vector<8x288xf32>
    %c3_74 = arith.constant 3 : index
    %c0_75 = arith.constant 0 : index
    %c0_76 = arith.constant 0 : index
    %83 = vector.load %arg4[%c3_74, %c0_75, %c0_76] : memref<9x8x8xf32, #tpu.memory_space<vmem>>, vector<1x8x8xf32>
    %84 = vector.shape_cast %83 : vector<1x8x8xf32> to vector<8x8xf32>
    %cst_77 = arith.constant dense<0.000000e+00> : vector<8x288xf32>
    %85 = tpu.matmul %84, %82, %cst_77 {dimension_numbers = #tpu.dot_dimension_numbers<[1], [0], [0], [1], [0, 0, 1, 1], [], []>} : vector<8x8xf32>, vector<8x288xf32>, vector<8x288xf32> -> vector<8x288xf32>
    %86 = arith.addf %81, %85 : vector<8x288xf32>
    %c0_78 = arith.constant 0 : index
    %c128_79 = arith.constant 128 : index
    %87 = vector.load %arg8[%c0_78, %c128_79] : memref<8x512xf32, #tpu.memory_space<vmem>>, vector<8x288xf32>
    %c4_80 = arith.constant 4 : index
    %c0_81 = arith.constant 0 : index
    %c0_82 = arith.constant 0 : index
    %88 = vector.load %arg4[%c4_80, %c0_81, %c0_82] : memref<9x8x8xf32, #tpu.memory_space<vmem>>, vector<1x8x8xf32>
    %89 = vector.shape_cast %88 : vector<1x8x8xf32> to vector<8x8xf32>
    %cst_83 = arith.constant dense<0.000000e+00> : vector<8x288xf32>
    %90 = tpu.matmul %89, %87, %cst_83 {dimension_numbers = #tpu.dot_dimension_numbers<[1], [0], [0], [1], [0, 0, 1, 1], [], []>} : vector<8x8xf32>, vector<8x288xf32>, vector<8x288xf32> -> vector<8x288xf32>
    %91 = arith.addf %86, %90 : vector<8x288xf32>
    %c0_84 = arith.constant 0 : index
    %c129 = arith.constant 129 : index
    %92 = vector.load %arg8[%c0_84, %c129] : memref<8x512xf32, #tpu.memory_space<vmem>>, vector<8x288xf32>
    %c5_85 = arith.constant 5 : index
    %c0_86 = arith.constant 0 : index
    %c0_87 = arith.constant 0 : index
    %93 = vector.load %arg4[%c5_85, %c0_86, %c0_87] : memref<9x8x8xf32, #tpu.memory_space<vmem>>, vector<1x8x8xf32>
    %94 = vector.shape_cast %93 : vector<1x8x8xf32> to vector<8x8xf32>
    %cst_88 = arith.constant dense<0.000000e+00> : vector<8x288xf32>
    %95 = tpu.matmul %94, %92, %cst_88 {dimension_numbers = #tpu.dot_dimension_numbers<[1], [0], [0], [1], [0, 0, 1, 1], [], []>} : vector<8x8xf32>, vector<8x288xf32>, vector<8x288xf32> -> vector<8x288xf32>
    %96 = arith.addf %91, %95 : vector<8x288xf32>
    %c0_89 = arith.constant 0 : index
    %c145 = arith.constant 145 : index
    %97 = vector.load %arg8[%c0_89, %c145] : memref<8x512xf32, #tpu.memory_space<vmem>>, vector<8x288xf32>
    %c6_90 = arith.constant 6 : index
    %c0_91 = arith.constant 0 : index
    %c0_92 = arith.constant 0 : index
    %98 = vector.load %arg4[%c6_90, %c0_91, %c0_92] : memref<9x8x8xf32, #tpu.memory_space<vmem>>, vector<1x8x8xf32>
    %99 = vector.shape_cast %98 : vector<1x8x8xf32> to vector<8x8xf32>
    %cst_93 = arith.constant dense<0.000000e+00> : vector<8x288xf32>
    %100 = tpu.matmul %99, %97, %cst_93 {dimension_numbers = #tpu.dot_dimension_numbers<[1], [0], [0], [1], [0, 0, 1, 1], [], []>} : vector<8x8xf32>, vector<8x288xf32>, vector<8x288xf32> -> vector<8x288xf32>
    %101 = arith.addf %96, %100 : vector<8x288xf32>
    %c0_94 = arith.constant 0 : index
    %c146 = arith.constant 146 : index
    %102 = vector.load %arg8[%c0_94, %c146] : memref<8x512xf32, #tpu.memory_space<vmem>>, vector<8x288xf32>
    %c7_95 = arith.constant 7 : index
    %c0_96 = arith.constant 0 : index
    %c0_97 = arith.constant 0 : index
    %103 = vector.load %arg4[%c7_95, %c0_96, %c0_97] : memref<9x8x8xf32, #tpu.memory_space<vmem>>, vector<1x8x8xf32>
    %104 = vector.shape_cast %103 : vector<1x8x8xf32> to vector<8x8xf32>
    %cst_98 = arith.constant dense<0.000000e+00> : vector<8x288xf32>
    %105 = tpu.matmul %104, %102, %cst_98 {dimension_numbers = #tpu.dot_dimension_numbers<[1], [0], [0], [1], [0, 0, 1, 1], [], []>} : vector<8x8xf32>, vector<8x288xf32>, vector<8x288xf32> -> vector<8x288xf32>
    %106 = arith.addf %101, %105 : vector<8x288xf32>
    %c0_99 = arith.constant 0 : index
    %c147 = arith.constant 147 : index
    %107 = vector.load %arg8[%c0_99, %c147] : memref<8x512xf32, #tpu.memory_space<vmem>>, vector<8x288xf32>
    %c8_100 = arith.constant 8 : index
    %c0_101 = arith.constant 0 : index
    %c0_102 = arith.constant 0 : index
    %108 = vector.load %arg4[%c8_100, %c0_101, %c0_102] : memref<9x8x8xf32, #tpu.memory_space<vmem>>, vector<1x8x8xf32>
    %109 = vector.shape_cast %108 : vector<1x8x8xf32> to vector<8x8xf32>
    %cst_103 = arith.constant dense<0.000000e+00> : vector<8x288xf32>
    %110 = tpu.matmul %109, %107, %cst_103 {dimension_numbers = #tpu.dot_dimension_numbers<[1], [0], [0], [1], [0, 0, 1, 1], [], []>} : vector<8x8xf32>, vector<8x288xf32>, vector<8x288xf32> -> vector<8x288xf32>
    %111 = arith.addf %106, %110 : vector<8x288xf32>
    %c0_104 = arith.constant 0 : index
    %c0_105 = arith.constant 0 : index
    %112 = vector.load %arg5[%c0_104, %c0_105] : memref<8x1xf32, #tpu.memory_space<vmem>>, vector<8x1xf32>
    %113 = vector.broadcast %112 : vector<8x1xf32> to vector<8x288xf32>
    %114 = arith.addf %111, %113 : vector<8x288xf32>
    %cst_106 = arith.constant 0.000000e+00 : f32
    %115 = vector.broadcast %cst_106 : f32 to vector<8x288xf32>
    %116 = arith.maximumf %114, %115 : vector<8x288xf32>
    %c0_107 = arith.constant 0 : index
    %c0_108 = arith.constant 0 : index
    %c0_109 = arith.constant 0 : index
    %117 = vector.load %arg7[%c0_107, %c0_108, %c0_109] : memref<1x8x288xf32, #tpu.memory_space<vmem>>, vector<1x8x288xf32>
    %118 = vector.shape_cast %117 : vector<1x8x288xf32> to vector<8x288xf32>
    %119 = vector.shape_cast %116 : vector<8x288xf32> to vector<1x8x288xf32>
    tpu.vector_store %arg7[%c0_107, %c0_108, %c0_109], %119 {strides = array<i32>} : memref<1x8x288xf32, #tpu.memory_space<vmem>>, vector<1x8x288xf32>,
    return
  }
  func.func @transform_0(%arg0: i32) -> (i32, i32, i32) {
    %c0_i32 = arith.constant 0 : i32
    %c0_i32_0 = arith.constant 0 : i32
    %c0_i32_1 = arith.constant 0 : i32
    return %arg0, %c0_i32, %c0_i32_0 : i32, i32, i32
  }
  func.func @transform_1(%arg0: i32) -> (i32, i32, i32) {
    %c0_i32 = arith.constant 0 : i32
    %c0_i32_0 = arith.constant 0 : i32
    %c0_i32_1 = arith.constant 0 : i32
    %c0_i32_2 = arith.constant 0 : i32
    return %c0_i32, %c0_i32_0, %c0_i32_1 : i32, i32, i32
  }
  func.func @transform_2(%arg0: i32) -> (i32, i32) {
    %c0_i32 = arith.constant 0 : i32
    %c0_i32_0 = arith.constant 0 : i32
    %c0_i32_1 = arith.constant 0 : i32
    return %c0_i32, %c0_i32_0 : i32, i32
  }
  func.func @transform_3(%arg0: i32) -> (i32, i32, i32) {
    %c0_i32 = arith.constant 0 : i32
    %c0_i32_0 = arith.constant 0 : i32
    %c0_i32_1 = arith.constant 0 : i32
    %c0_i32_2 = arith.constant 0 : i32
    return %c0_i32, %c0_i32_0, %c0_i32_1 : i32, i32, i32
  }
  func.func @transform_4(%arg0: i32) -> (i32, i32) {
    %c0_i32 = arith.constant 0 : i32
    %c0_i32_0 = arith.constant 0 : i32
    %c0_i32_1 = arith.constant 0 : i32
    return %c0_i32, %c0_i32_0 : i32, i32
  }
  func.func @transform_5(%arg0: i32) -> (i32, i32) {
    %c0_i32 = arith.constant 0 : i32
    %c0_i32_0 = arith.constant 0 : i32
    %c0_i32_1 = arith.constant 0 : i32
    return %c0_i32, %c0_i32_0 : i32, i32
  }
  func.func @transform_6(%arg0: i32) -> (i32, i32, i32) {
    %c0_i32 = arith.constant 0 : i32
    %c0_i32_0 = arith.constant 0 : i32
    %c0_i32_1 = arith.constant 0 : i32
    return %arg0, %c0_i32, %c0_i32_0 : i32, i32, i32
  }
}

module attributes {stable_mosaic.version = 11 : i64} {
  func.func @_block_kernel(%arg0: i32, %arg1: memref<1x8x128xbf16, #tpu.memory_space<vmem>>, %arg2: memref<9x16x8xbf16, #tpu.memory_space<vmem>>, %arg3: memref<16x1xf32, #tpu.memory_space<vmem>>, %arg4: memref<9x16x16xf32, #tpu.memory_space<vmem>>, %arg5: memref<16x1xf32, #tpu.memory_space<vmem>>, %arg6: memref<1x80xf32, #tpu.memory_space<vmem>>, %arg7: memref<1x16x80xf32, #tpu.memory_space<vmem>>, %arg8: memref<16x256xf32, #tpu.memory_space<vmem>>) attributes {dimension_semantics = [#tpu.dimension_semantics<parallel>], iteration_bounds = array<i64: 2>, scalar_prefetch = 0 : i64, scratch_operands = 1 : i64, tpu.core_type = #tpu.core_type<tc>, window_params = [{transform_indices = @transform_0, window_bounds = array<i64: 1, 8, 128>}, {pipeline_mode = #tpu.pipeline_mode<synchronous>, transform_indices = @transform_1, window_bounds = array<i64: 9, 16, 8>}, {pipeline_mode = #tpu.pipeline_mode<synchronous>, transform_indices = @transform_2, window_bounds = array<i64: 16, 1>}, {pipeline_mode = #tpu.pipeline_mode<synchronous>, transform_indices = @transform_3, window_bounds = array<i64: 9, 16, 16>}, {pipeline_mode = #tpu.pipeline_mode<synchronous>, transform_indices = @transform_4, window_bounds = array<i64: 16, 1>}, {pipeline_mode = #tpu.pipeline_mode<synchronous>, transform_indices = @transform_5, window_bounds = array<i64: 1, 80>}, {transform_indices = @transform_6, window_bounds = array<i64: 1, 16, 80>}]} {
    %cst = arith.constant 0.000000e+00 : f32
    %0 = vector.broadcast %cst : f32 to vector<16x80xf32>
    %c0 = arith.constant 0 : index
    %c0_0 = arith.constant 0 : index
    %c0_1 = arith.constant 0 : index
    %1 = vector.load %arg1[%c0, %c0_0, %c0_1] : memref<1x8x128xbf16, #tpu.memory_space<vmem>>, vector<1x8x80xbf16>
    %2 = vector.shape_cast %1 : vector<1x8x80xbf16> to vector<8x80xbf16>
    %c0_2 = arith.constant 0 : index
    %c0_3 = arith.constant 0 : index
    %c0_4 = arith.constant 0 : index
    %3 = vector.load %arg2[%c0_2, %c0_3, %c0_4] : memref<9x16x8xbf16, #tpu.memory_space<vmem>>, vector<1x16x8xbf16>
    %4 = vector.shape_cast %3 : vector<1x16x8xbf16> to vector<16x8xbf16>
    %cst_5 = arith.constant dense<0.000000e+00> : vector<16x80xf32>
    %5 = tpu.matmul %4, %2, %cst_5 {dimension_numbers = #tpu.dot_dimension_numbers<[1], [0], [0], [1], [0, 0, 1, 1], [], []>} : vector<16x8xbf16>, vector<8x80xbf16>, vector<16x80xf32> -> vector<16x80xf32>
    %6 = arith.addf %0, %5 : vector<16x80xf32>
    %c0_6 = arith.constant 0 : index
    %c0_7 = arith.constant 0 : index
    %c1 = arith.constant 1 : index
    %7 = vector.load %arg1[%c0_6, %c0_7, %c1] : memref<1x8x128xbf16, #tpu.memory_space<vmem>>, vector<1x8x80xbf16>
    %8 = vector.shape_cast %7 : vector<1x8x80xbf16> to vector<8x80xbf16>
    %c1_8 = arith.constant 1 : index
    %c0_9 = arith.constant 0 : index
    %c0_10 = arith.constant 0 : index
    %9 = vector.load %arg2[%c1_8, %c0_9, %c0_10] : memref<9x16x8xbf16, #tpu.memory_space<vmem>>, vector<1x16x8xbf16>
    %10 = vector.shape_cast %9 : vector<1x16x8xbf16> to vector<16x8xbf16>
    %cst_11 = arith.constant dense<0.000000e+00> : vector<16x80xf32>
    %11 = tpu.matmul %10, %8, %cst_11 {dimension_numbers = #tpu.dot_dimension_numbers<[1], [0], [0], [1], [0, 0, 1, 1], [], []>} : vector<16x8xbf16>, vector<8x80xbf16>, vector<16x80xf32> -> vector<16x80xf32>
    %12 = arith.addf %6, %11 : vector<16x80xf32>
    %c0_12 = arith.constant 0 : index
    %c0_13 = arith.constant 0 : index
    %c2 = arith.constant 2 : index
    %13 = vector.load %arg1[%c0_12, %c0_13, %c2] : memref<1x8x128xbf16, #tpu.memory_space<vmem>>, vector<1x8x80xbf16>
    %14 = vector.shape_cast %13 : vector<1x8x80xbf16> to vector<8x80xbf16>
    %c2_14 = arith.constant 2 : index
    %c0_15 = arith.constant 0 : index
    %c0_16 = arith.constant 0 : index
    %15 = vector.load %arg2[%c2_14, %c0_15, %c0_16] : memref<9x16x8xbf16, #tpu.memory_space<vmem>>, vector<1x16x8xbf16>
    %16 = vector.shape_cast %15 : vector<1x16x8xbf16> to vector<16x8xbf16>
    %cst_17 = arith.constant dense<0.000000e+00> : vector<16x80xf32>
    %17 = tpu.matmul %16, %14, %cst_17 {dimension_numbers = #tpu.dot_dimension_numbers<[1], [0], [0], [1], [0, 0, 1, 1], [], []>} : vector<16x8xbf16>, vector<8x80xbf16>, vector<16x80xf32> -> vector<16x80xf32>
    %18 = arith.addf %12, %17 : vector<16x80xf32>
    %c0_18 = arith.constant 0 : index
    %c0_19 = arith.constant 0 : index
    %c10 = arith.constant 10 : index
    %19 = vector.load %arg1[%c0_18, %c0_19, %c10] : memref<1x8x128xbf16, #tpu.memory_space<vmem>>, vector<1x8x80xbf16>
    %20 = vector.shape_cast %19 : vector<1x8x80xbf16> to vector<8x80xbf16>
    %c3 = arith.constant 3 : index
    %c0_20 = arith.constant 0 : index
    %c0_21 = arith.constant 0 : index
    %21 = vector.load %arg2[%c3, %c0_20, %c0_21] : memref<9x16x8xbf16, #tpu.memory_space<vmem>>, vector<1x16x8xbf16>
    %22 = vector.shape_cast %21 : vector<1x16x8xbf16> to vector<16x8xbf16>
    %cst_22 = arith.constant dense<0.000000e+00> : vector<16x80xf32>
    %23 = tpu.matmul %22, %20, %cst_22 {dimension_numbers = #tpu.dot_dimension_numbers<[1], [0], [0], [1], [0, 0, 1, 1], [], []>} : vector<16x8xbf16>, vector<8x80xbf16>, vector<16x80xf32> -> vector<16x80xf32>
    %24 = arith.addf %18, %23 : vector<16x80xf32>
    %c0_23 = arith.constant 0 : index
    %c0_24 = arith.constant 0 : index
    %c11 = arith.constant 11 : index
    %25 = vector.load %arg1[%c0_23, %c0_24, %c11] : memref<1x8x128xbf16, #tpu.memory_space<vmem>>, vector<1x8x80xbf16>
    %26 = vector.shape_cast %25 : vector<1x8x80xbf16> to vector<8x80xbf16>
    %c4 = arith.constant 4 : index
    %c0_25 = arith.constant 0 : index
    %c0_26 = arith.constant 0 : index
    %27 = vector.load %arg2[%c4, %c0_25, %c0_26] : memref<9x16x8xbf16, #tpu.memory_space<vmem>>, vector<1x16x8xbf16>
    %28 = vector.shape_cast %27 : vector<1x16x8xbf16> to vector<16x8xbf16>
    %cst_27 = arith.constant dense<0.000000e+00> : vector<16x80xf32>
    %29 = tpu.matmul %28, %26, %cst_27 {dimension_numbers = #tpu.dot_dimension_numbers<[1], [0], [0], [1], [0, 0, 1, 1], [], []>} : vector<16x8xbf16>, vector<8x80xbf16>, vector<16x80xf32> -> vector<16x80xf32>
    %30 = arith.addf %24, %29 : vector<16x80xf32>
    %c0_28 = arith.constant 0 : index
    %c0_29 = arith.constant 0 : index
    %c12 = arith.constant 12 : index
    %31 = vector.load %arg1[%c0_28, %c0_29, %c12] : memref<1x8x128xbf16, #tpu.memory_space<vmem>>, vector<1x8x80xbf16>
    %32 = vector.shape_cast %31 : vector<1x8x80xbf16> to vector<8x80xbf16>
    %c5 = arith.constant 5 : index
    %c0_30 = arith.constant 0 : index
    %c0_31 = arith.constant 0 : index
    %33 = vector.load %arg2[%c5, %c0_30, %c0_31] : memref<9x16x8xbf16, #tpu.memory_space<vmem>>, vector<1x16x8xbf16>
    %34 = vector.shape_cast %33 : vector<1x16x8xbf16> to vector<16x8xbf16>
    %cst_32 = arith.constant dense<0.000000e+00> : vector<16x80xf32>
    %35 = tpu.matmul %34, %32, %cst_32 {dimension_numbers = #tpu.dot_dimension_numbers<[1], [0], [0], [1], [0, 0, 1, 1], [], []>} : vector<16x8xbf16>, vector<8x80xbf16>, vector<16x80xf32> -> vector<16x80xf32>
    %36 = arith.addf %30, %35 : vector<16x80xf32>
    %c0_33 = arith.constant 0 : index
    %c0_34 = arith.constant 0 : index
    %c20 = arith.constant 20 : index
    %37 = vector.load %arg1[%c0_33, %c0_34, %c20] : memref<1x8x128xbf16, #tpu.memory_space<vmem>>, vector<1x8x80xbf16>
    %38 = vector.shape_cast %37 : vector<1x8x80xbf16> to vector<8x80xbf16>
    %c6 = arith.constant 6 : index
    %c0_35 = arith.constant 0 : index
    %c0_36 = arith.constant 0 : index
    %39 = vector.load %arg2[%c6, %c0_35, %c0_36] : memref<9x16x8xbf16, #tpu.memory_space<vmem>>, vector<1x16x8xbf16>
    %40 = vector.shape_cast %39 : vector<1x16x8xbf16> to vector<16x8xbf16>
    %cst_37 = arith.constant dense<0.000000e+00> : vector<16x80xf32>
    %41 = tpu.matmul %40, %38, %cst_37 {dimension_numbers = #tpu.dot_dimension_numbers<[1], [0], [0], [1], [0, 0, 1, 1], [], []>} : vector<16x8xbf16>, vector<8x80xbf16>, vector<16x80xf32> -> vector<16x80xf32>
    %42 = arith.addf %36, %41 : vector<16x80xf32>
    %c0_38 = arith.constant 0 : index
    %c0_39 = arith.constant 0 : index
    %c21 = arith.constant 21 : index
    %43 = vector.load %arg1[%c0_38, %c0_39, %c21] : memref<1x8x128xbf16, #tpu.memory_space<vmem>>, vector<1x8x80xbf16>
    %44 = vector.shape_cast %43 : vector<1x8x80xbf16> to vector<8x80xbf16>
    %c7 = arith.constant 7 : index
    %c0_40 = arith.constant 0 : index
    %c0_41 = arith.constant 0 : index
    %45 = vector.load %arg2[%c7, %c0_40, %c0_41] : memref<9x16x8xbf16, #tpu.memory_space<vmem>>, vector<1x16x8xbf16>
    %46 = vector.shape_cast %45 : vector<1x16x8xbf16> to vector<16x8xbf16>
    %cst_42 = arith.constant dense<0.000000e+00> : vector<16x80xf32>
    %47 = tpu.matmul %46, %44, %cst_42 {dimension_numbers = #tpu.dot_dimension_numbers<[1], [0], [0], [1], [0, 0, 1, 1], [], []>} : vector<16x8xbf16>, vector<8x80xbf16>, vector<16x80xf32> -> vector<16x80xf32>
    %48 = arith.addf %42, %47 : vector<16x80xf32>
    %c0_43 = arith.constant 0 : index
    %c0_44 = arith.constant 0 : index
    %c22 = arith.constant 22 : index
    %49 = vector.load %arg1[%c0_43, %c0_44, %c22] : memref<1x8x128xbf16, #tpu.memory_space<vmem>>, vector<1x8x80xbf16>
    %50 = vector.shape_cast %49 : vector<1x8x80xbf16> to vector<8x80xbf16>
    %c8 = arith.constant 8 : index
    %c0_45 = arith.constant 0 : index
    %c0_46 = arith.constant 0 : index
    %51 = vector.load %arg2[%c8, %c0_45, %c0_46] : memref<9x16x8xbf16, #tpu.memory_space<vmem>>, vector<1x16x8xbf16>
    %52 = vector.shape_cast %51 : vector<1x16x8xbf16> to vector<16x8xbf16>
    %cst_47 = arith.constant dense<0.000000e+00> : vector<16x80xf32>
    %53 = tpu.matmul %52, %50, %cst_47 {dimension_numbers = #tpu.dot_dimension_numbers<[1], [0], [0], [1], [0, 0, 1, 1], [], []>} : vector<16x8xbf16>, vector<8x80xbf16>, vector<16x80xf32> -> vector<16x80xf32>
    %54 = arith.addf %48, %53 : vector<16x80xf32>
    %c0_48 = arith.constant 0 : index
    %c0_49 = arith.constant 0 : index
    %55 = vector.load %arg3[%c0_48, %c0_49] : memref<16x1xf32, #tpu.memory_space<vmem>>, vector<16x1xf32>
    %56 = vector.broadcast %55 : vector<16x1xf32> to vector<16x80xf32>
    %57 = arith.addf %54, %56 : vector<16x80xf32>
    %cst_50 = arith.constant 0.000000e+00 : f32
    %58 = vector.broadcast %cst_50 : f32 to vector<16x80xf32>
    %59 = arith.maximumf %57, %58 : vector<16x80xf32>
    %c0_51 = arith.constant 0 : index
    %c0_52 = arith.constant 0 : index
    %60 = vector.load %arg6[%c0_51, %c0_52] : memref<1x80xf32, #tpu.memory_space<vmem>>, vector<1x80xf32>
    %61 = vector.broadcast %60 : vector<1x80xf32> to vector<16x80xf32>
    %62 = arith.mulf %59, %61 : vector<16x80xf32>
    %cst_53 = arith.constant 0.000000e+00 : f32
    %63 = vector.broadcast %cst_53 : f32 to vector<16x256xf32>
    %c0_54 = arith.constant 0 : index
    %c0_55 = arith.constant 0 : index
    %64 = vector.load %arg8[%c0_54, %c0_55] : memref<16x256xf32, #tpu.memory_space<vmem>>, vector<16x256xf32>
    tpu.vector_store %arg8[%c0_54, %c0_55], %63 {strides = array<i32>} : memref<16x256xf32, #tpu.memory_space<vmem>>, vector<16x256xf32>,
    %c0_56 = arith.constant 0 : index
    %c128 = arith.constant 128 : index
    %65 = vector.load %arg8[%c0_56, %c128] : memref<16x256xf32, #tpu.memory_space<vmem>>, vector<16x80xf32>
    tpu.vector_store %arg8[%c0_56, %c128], %62 {strides = array<i32>} : memref<16x256xf32, #tpu.memory_space<vmem>>, vector<16x80xf32>,
    %cst_57 = arith.constant 0.000000e+00 : f32
    %66 = vector.broadcast %cst_57 : f32 to vector<16x80xf32>
    %c0_58 = arith.constant 0 : index
    %c117 = arith.constant 117 : index
    %67 = vector.load %arg8[%c0_58, %c117] : memref<16x256xf32, #tpu.memory_space<vmem>>, vector<16x80xf32>
    %c0_59 = arith.constant 0 : index
    %c0_60 = arith.constant 0 : index
    %c0_61 = arith.constant 0 : index
    %68 = vector.load %arg4[%c0_59, %c0_60, %c0_61] : memref<9x16x16xf32, #tpu.memory_space<vmem>>, vector<1x16x16xf32>
    %69 = vector.shape_cast %68 : vector<1x16x16xf32> to vector<16x16xf32>
    %cst_62 = arith.constant dense<0.000000e+00> : vector<16x80xf32>
    %70 = tpu.matmul %69, %67, %cst_62 {dimension_numbers = #tpu.dot_dimension_numbers<[1], [0], [0], [1], [0, 0, 1, 1], [], []>} : vector<16x16xf32>, vector<16x80xf32>, vector<16x80xf32> -> vector<16x80xf32>
    %71 = arith.addf %66, %70 : vector<16x80xf32>
    %c0_63 = arith.constant 0 : index
    %c118 = arith.constant 118 : index
    %72 = vector.load %arg8[%c0_63, %c118] : memref<16x256xf32, #tpu.memory_space<vmem>>, vector<16x80xf32>
    %c1_64 = arith.constant 1 : index
    %c0_65 = arith.constant 0 : index
    %c0_66 = arith.constant 0 : index
    %73 = vector.load %arg4[%c1_64, %c0_65, %c0_66] : memref<9x16x16xf32, #tpu.memory_space<vmem>>, vector<1x16x16xf32>
    %74 = vector.shape_cast %73 : vector<1x16x16xf32> to vector<16x16xf32>
    %cst_67 = arith.constant dense<0.000000e+00> : vector<16x80xf32>
    %75 = tpu.matmul %74, %72, %cst_67 {dimension_numbers = #tpu.dot_dimension_numbers<[1], [0], [0], [1], [0, 0, 1, 1], [], []>} : vector<16x16xf32>, vector<16x80xf32>, vector<16x80xf32> -> vector<16x80xf32>
    %76 = arith.addf %71, %75 : vector<16x80xf32>
    %c0_68 = arith.constant 0 : index
    %c119 = arith.constant 119 : index
    %77 = vector.load %arg8[%c0_68, %c119] : memref<16x256xf32, #tpu.memory_space<vmem>>, vector<16x80xf32>
    %c2_69 = arith.constant 2 : index
    %c0_70 = arith.constant 0 : index
    %c0_71 = arith.constant 0 : index
    %78 = vector.load %arg4[%c2_69, %c0_70, %c0_71] : memref<9x16x16xf32, #tpu.memory_space<vmem>>, vector<1x16x16xf32>
    %79 = vector.shape_cast %78 : vector<1x16x16xf32> to vector<16x16xf32>
    %cst_72 = arith.constant dense<0.000000e+00> : vector<16x80xf32>
    %80 = tpu.matmul %79, %77, %cst_72 {dimension_numbers = #tpu.dot_dimension_numbers<[1], [0], [0], [1], [0, 0, 1, 1], [], []>} : vector<16x16xf32>, vector<16x80xf32>, vector<16x80xf32> -> vector<16x80xf32>
    %81 = arith.addf %76, %80 : vector<16x80xf32>
    %c0_73 = arith.constant 0 : index
    %c127 = arith.constant 127 : index
    %82 = vector.load %arg8[%c0_73, %c127] : memref<16x256xf32, #tpu.memory_space<vmem>>, vector<16x80xf32>
    %c3_74 = arith.constant 3 : index
    %c0_75 = arith.constant 0 : index
    %c0_76 = arith.constant 0 : index
    %83 = vector.load %arg4[%c3_74, %c0_75, %c0_76] : memref<9x16x16xf32, #tpu.memory_space<vmem>>, vector<1x16x16xf32>
    %84 = vector.shape_cast %83 : vector<1x16x16xf32> to vector<16x16xf32>
    %cst_77 = arith.constant dense<0.000000e+00> : vector<16x80xf32>
    %85 = tpu.matmul %84, %82, %cst_77 {dimension_numbers = #tpu.dot_dimension_numbers<[1], [0], [0], [1], [0, 0, 1, 1], [], []>} : vector<16x16xf32>, vector<16x80xf32>, vector<16x80xf32> -> vector<16x80xf32>
    %86 = arith.addf %81, %85 : vector<16x80xf32>
    %c0_78 = arith.constant 0 : index
    %c128_79 = arith.constant 128 : index
    %87 = vector.load %arg8[%c0_78, %c128_79] : memref<16x256xf32, #tpu.memory_space<vmem>>, vector<16x80xf32>
    %c4_80 = arith.constant 4 : index
    %c0_81 = arith.constant 0 : index
    %c0_82 = arith.constant 0 : index
    %88 = vector.load %arg4[%c4_80, %c0_81, %c0_82] : memref<9x16x16xf32, #tpu.memory_space<vmem>>, vector<1x16x16xf32>
    %89 = vector.shape_cast %88 : vector<1x16x16xf32> to vector<16x16xf32>
    %cst_83 = arith.constant dense<0.000000e+00> : vector<16x80xf32>
    %90 = tpu.matmul %89, %87, %cst_83 {dimension_numbers = #tpu.dot_dimension_numbers<[1], [0], [0], [1], [0, 0, 1, 1], [], []>} : vector<16x16xf32>, vector<16x80xf32>, vector<16x80xf32> -> vector<16x80xf32>
    %91 = arith.addf %86, %90 : vector<16x80xf32>
    %c0_84 = arith.constant 0 : index
    %c129 = arith.constant 129 : index
    %92 = vector.load %arg8[%c0_84, %c129] : memref<16x256xf32, #tpu.memory_space<vmem>>, vector<16x80xf32>
    %c5_85 = arith.constant 5 : index
    %c0_86 = arith.constant 0 : index
    %c0_87 = arith.constant 0 : index
    %93 = vector.load %arg4[%c5_85, %c0_86, %c0_87] : memref<9x16x16xf32, #tpu.memory_space<vmem>>, vector<1x16x16xf32>
    %94 = vector.shape_cast %93 : vector<1x16x16xf32> to vector<16x16xf32>
    %cst_88 = arith.constant dense<0.000000e+00> : vector<16x80xf32>
    %95 = tpu.matmul %94, %92, %cst_88 {dimension_numbers = #tpu.dot_dimension_numbers<[1], [0], [0], [1], [0, 0, 1, 1], [], []>} : vector<16x16xf32>, vector<16x80xf32>, vector<16x80xf32> -> vector<16x80xf32>
    %96 = arith.addf %91, %95 : vector<16x80xf32>
    %c0_89 = arith.constant 0 : index
    %c137 = arith.constant 137 : index
    %97 = vector.load %arg8[%c0_89, %c137] : memref<16x256xf32, #tpu.memory_space<vmem>>, vector<16x80xf32>
    %c6_90 = arith.constant 6 : index
    %c0_91 = arith.constant 0 : index
    %c0_92 = arith.constant 0 : index
    %98 = vector.load %arg4[%c6_90, %c0_91, %c0_92] : memref<9x16x16xf32, #tpu.memory_space<vmem>>, vector<1x16x16xf32>
    %99 = vector.shape_cast %98 : vector<1x16x16xf32> to vector<16x16xf32>
    %cst_93 = arith.constant dense<0.000000e+00> : vector<16x80xf32>
    %100 = tpu.matmul %99, %97, %cst_93 {dimension_numbers = #tpu.dot_dimension_numbers<[1], [0], [0], [1], [0, 0, 1, 1], [], []>} : vector<16x16xf32>, vector<16x80xf32>, vector<16x80xf32> -> vector<16x80xf32>
    %101 = arith.addf %96, %100 : vector<16x80xf32>
    %c0_94 = arith.constant 0 : index
    %c138 = arith.constant 138 : index
    %102 = vector.load %arg8[%c0_94, %c138] : memref<16x256xf32, #tpu.memory_space<vmem>>, vector<16x80xf32>
    %c7_95 = arith.constant 7 : index
    %c0_96 = arith.constant 0 : index
    %c0_97 = arith.constant 0 : index
    %103 = vector.load %arg4[%c7_95, %c0_96, %c0_97] : memref<9x16x16xf32, #tpu.memory_space<vmem>>, vector<1x16x16xf32>
    %104 = vector.shape_cast %103 : vector<1x16x16xf32> to vector<16x16xf32>
    %cst_98 = arith.constant dense<0.000000e+00> : vector<16x80xf32>
    %105 = tpu.matmul %104, %102, %cst_98 {dimension_numbers = #tpu.dot_dimension_numbers<[1], [0], [0], [1], [0, 0, 1, 1], [], []>} : vector<16x16xf32>, vector<16x80xf32>, vector<16x80xf32> -> vector<16x80xf32>
    %106 = arith.addf %101, %105 : vector<16x80xf32>
    %c0_99 = arith.constant 0 : index
    %c139 = arith.constant 139 : index
    %107 = vector.load %arg8[%c0_99, %c139] : memref<16x256xf32, #tpu.memory_space<vmem>>, vector<16x80xf32>
    %c8_100 = arith.constant 8 : index
    %c0_101 = arith.constant 0 : index
    %c0_102 = arith.constant 0 : index
    %108 = vector.load %arg4[%c8_100, %c0_101, %c0_102] : memref<9x16x16xf32, #tpu.memory_space<vmem>>, vector<1x16x16xf32>
    %109 = vector.shape_cast %108 : vector<1x16x16xf32> to vector<16x16xf32>
    %cst_103 = arith.constant dense<0.000000e+00> : vector<16x80xf32>
    %110 = tpu.matmul %109, %107, %cst_103 {dimension_numbers = #tpu.dot_dimension_numbers<[1], [0], [0], [1], [0, 0, 1, 1], [], []>} : vector<16x16xf32>, vector<16x80xf32>, vector<16x80xf32> -> vector<16x80xf32>
    %111 = arith.addf %106, %110 : vector<16x80xf32>
    %c0_104 = arith.constant 0 : index
    %c0_105 = arith.constant 0 : index
    %112 = vector.load %arg5[%c0_104, %c0_105] : memref<16x1xf32, #tpu.memory_space<vmem>>, vector<16x1xf32>
    %113 = vector.broadcast %112 : vector<16x1xf32> to vector<16x80xf32>
    %114 = arith.addf %111, %113 : vector<16x80xf32>
    %cst_106 = arith.constant 0.000000e+00 : f32
    %115 = vector.broadcast %cst_106 : f32 to vector<16x80xf32>
    %116 = arith.maximumf %114, %115 : vector<16x80xf32>
    %c0_107 = arith.constant 0 : index
    %c0_108 = arith.constant 0 : index
    %c0_109 = arith.constant 0 : index
    %117 = vector.load %arg7[%c0_107, %c0_108, %c0_109] : memref<1x16x80xf32, #tpu.memory_space<vmem>>, vector<1x16x80xf32>
    %118 = vector.shape_cast %117 : vector<1x16x80xf32> to vector<16x80xf32>
    %119 = vector.shape_cast %116 : vector<16x80xf32> to vector<1x16x80xf32>
    tpu.vector_store %arg7[%c0_107, %c0_108, %c0_109], %119 {strides = array<i32>} : memref<1x16x80xf32, #tpu.memory_space<vmem>>, vector<1x16x80xf32>,
    return
  }
  func.func @transform_0(%arg0: i32) -> (i32, i32, i32) {
    %c0_i32 = arith.constant 0 : i32
    %c0_i32_0 = arith.constant 0 : i32
    %c0_i32_1 = arith.constant 0 : i32
    return %arg0, %c0_i32, %c0_i32_0 : i32, i32, i32
  }
  func.func @transform_1(%arg0: i32) -> (i32, i32, i32) {
    %c0_i32 = arith.constant 0 : i32
    %c0_i32_0 = arith.constant 0 : i32
    %c0_i32_1 = arith.constant 0 : i32
    %c0_i32_2 = arith.constant 0 : i32
    return %c0_i32, %c0_i32_0, %c0_i32_1 : i32, i32, i32
  }
  func.func @transform_2(%arg0: i32) -> (i32, i32) {
    %c0_i32 = arith.constant 0 : i32
    %c0_i32_0 = arith.constant 0 : i32
    %c0_i32_1 = arith.constant 0 : i32
    return %c0_i32, %c0_i32_0 : i32, i32
  }
  func.func @transform_3(%arg0: i32) -> (i32, i32, i32) {
    %c0_i32 = arith.constant 0 : i32
    %c0_i32_0 = arith.constant 0 : i32
    %c0_i32_1 = arith.constant 0 : i32
    %c0_i32_2 = arith.constant 0 : i32
    return %c0_i32, %c0_i32_0, %c0_i32_1 : i32, i32, i32
  }
  func.func @transform_4(%arg0: i32) -> (i32, i32) {
    %c0_i32 = arith.constant 0 : i32
    %c0_i32_0 = arith.constant 0 : i32
    %c0_i32_1 = arith.constant 0 : i32
    return %c0_i32, %c0_i32_0 : i32, i32
  }
  func.func @transform_5(%arg0: i32) -> (i32, i32) {
    %c0_i32 = arith.constant 0 : i32
    %c0_i32_0 = arith.constant 0 : i32
    %c0_i32_1 = arith.constant 0 : i32
    return %c0_i32, %c0_i32_0 : i32, i32
  }
  func.func @transform_6(%arg0: i32) -> (i32, i32, i32) {
    %c0_i32 = arith.constant 0 : i32
    %c0_i32_0 = arith.constant 0 : i32
    %c0_i32_1 = arith.constant 0 : i32
    return %arg0, %c0_i32, %c0_i32_0 : i32, i32, i32
  }
}

</mosaic_0001>

<bundles_post_ra>
// kernel: a_call__.3
= control target key start
LH: loop header
LB: loop body
LE: loop exit
PB: predicated region body
PF: predicated region fallthrough
CT: control target
= control target key end

     0   :  { %s2106_s21 = smov 0   ;;  %s2343_s0 = inlined_call_operand.vmem [shape: bf16[2,8,128], index: 0, kind: input, shape index: {}]   ;;  %s2344_s1 = inlined_call_operand.vmem [shape: bf16[9,16,8], index: 1, kind: input, shape index: {}]   ;;  %s2345_s2 = inlined_call_operand.vmem [shape: f32[16,1], index: 2, kind: input, shape index: {}]   ;;  %s2346_s3 = inlined_call_operand.vmem [shape: f32[9,16,16], index: 3, kind: input, shape index: {}]   ;;  %s2347_s4 = inlined_call_operand.vmem [shape: f32[16,1], index: 4, kind: input, shape index: {}]   ;;  %s2348_s5 = inlined_call_operand.vmem [shape: f32[1,80], index: 5, kind: input, shape index: {}]   ;;  %s2349_s6 = inlined_call_operand.vmem [shape: f32[2,16,80], index: 6, kind: output, shape index: {}]  }
   0x1 LB: > { %s1739_s22 = sadd.s32 4294967295, %s2053_s21   ;;  %p1743_p0 = scmp.ge.s32.totalorder %s2053_s21, 1  ;;  %s2053_s21 = sphi %s2106_s21, %s16_s21  }
   0x2   : > { %p211_p1 = scmp.lt.s32.totalorder %s2053_s21, 3 }
   0x4   : > { %p212_p2 = pnand %p1743_p0, %p211_p1 }
   0x5   : > { %p240_p3 = scmp.lt.s32.totalorder (!%p212_p2), %s1739_s22, 1  ;;  %s2057_s29 = smov (!%p212_p2), 127  }
   0x6   : > { %215 = sbr.rel (%p212_p2) target bundleno = 728 (0x2d8), region = 44  ;;  %s2058_s30 = smov (!%p212_p2), 118  }
   0x7   : > { %s2059_s7 = smov (!%p212_p2), 126   ;;  %s2060_s8 = smov (!%p212_p2), 117  }
   0x8   : > { %s2061_s9 = smov (!%p212_p2), 116   ;;  %s2062_s10 = smov (!%p212_p2), 108  }
   0x9   : > { %s2063_s11 = smov (!%p212_p2), 107   ;;  %s2064_s12 = smov (!%p212_p2), 106  }
   0xa   : > { %s2066_s14 = smov (!%p212_p2), 10   ;;  %s2067_s15 = smov (!%p212_p2), 11  }
   0xb   : > { %v2055_v0 = vmov 0.0   ;;  %s2351_s22 = smov (!%p240_p3, %s1739_s22), 1  ;;  %vm2056_vm0 = vmmov 0   ;;  %vm270_vm1 = vcmask 1043456   ;;  %vm266_vm2 = vcmask 64512   ;;  %v2039_v4 = vld [vmem:[%s2344_s1] sm:$0xff]  }
   0xc   : > { %1874 = vmatprep.subr.bf16.mxu0 %v2055_v0  ;;  %806 = vst [vmem:[#allocation2 + $0x8] sm:$0xff] %v2055_v0  ;;  %808 = vst [vmem:[#allocation2 + $0x18] sm:$0xff] %v2055_v0  ;;  %1880 = vmatprep.subr.bf16.mxu1 %v2055_v0  ;;  %s1744_s23 = sshll.u32 %s2351_s22, 2  ;;  %v780_v5 = vld [vmem:[%s2345_s2] sm:$0xff]  ;;  %v781_v6 = vld [vmem:[%s2345_s2 + $0x8] sm:$0xff]  ;;  %v2065_v7 = vmov 0  }
   0xd   : > { %1876 = vmatprep.mubr.msk.bf16.mxu0 %vm2056_vm0, %v2055_v0  ;;  %1882 = vmatprep.mubr.msk.bf16.mxu1 %vm2056_vm0, %v2055_v0  ;;  %s243_s26 = scalar_lea.vmem %s2343_s0, %s1744_s23  ;;  %v2038_v11 = vld [vmem:[%s2344_s1 + $0x8] sm:$0xff]   ;;  %v2040_v13 = vld [vmem:[%s2344_s1 + $0x18] sm:$0xff]   ;;  %v2041_v18 = vld [vmem:[%s2344_s1 + $0x10] sm:$0xff]   ;;  %s2068_s16 = smov 9   ;;  %vm809_vm3 = vcmask 654336   ;;  %vm838_vm4 = vcmask 130048  }
   0xe   : > { %v250_v1 = vld [vmem:[%s243_s26] sm:$0xf]  ;;  %2016 = vset.pattern.permute.xlu1 %v2065_v7  ;;  %2015 = vset.pattern.permute.xlu0 %v2065_v7  ;;  %v2043_v20 = vld [vmem:[%s2344_s1 + $0x28] sm:$0xff]   ;;  %v2045_v26 = vld [vmem:[%s2344_s1 + $0x38] sm:$0xff]   ;;  %s2069_s17 = smov 1   ;;  %s2070_s26 = smov 119  }
   0xf   : > { %v1750_v2 = vcombine.low %v250_v1, %v250_v1  ;;  %v324_v3 = vsel %vm270_vm1, %v250_v1, 0  ;;  %v2042_v25 = vld [vmem:[%s2344_s1 + $0x20] sm:$0xff]   ;;  %v2044_v29 = vld [vmem:[%s2344_s1 + $0x30] sm:$0xff]   ;;  %vm833_vm5 = vcmask 80896   ;;  %vm928_vm6 = vcmask 89088  }
  0x10   : > { %1881 = vmatpush3.bf16.msra.mxu1 %v324_v3  ;;  %v2046_v31 = vld [vmem:[%s2344_s1 + $0x40] sm:$0xff]   ;;  %vm1025_vm7 = vcmask 72704   ;;  %vm1124_vm8 = vcmask 7168  }
  0x11   : > { %264 = vrot.lane.b32.xlu0 %v1750_v2, %s2057_s29  ;;  %434 = vrot.lane.b32.xlu1 %v1750_v2, %s2058_s30 }
  0x12   : > { %1892 = vmatprep.subr.bf16.mxu1 %v2055_v0 }
  0x13   : > { %1883 = vmatmul.mubr.msk.bf16.vlgmr.msra.gmra.mxu1 %vm266_vm2, %v2039_v4 }
  0x14   : > { %1894 = vmatprep.mubr.msk.bf16.mxu1 %vm2056_vm0, %v2055_v0 }
  0x15   : > { %375 = vrot.lane.b32.xlu0 %v1750_v2, %s2059_s7  ;;  %493 = vrot.lane.b32.xlu1 %v1750_v2, %s2060_s8 }
  0x19   : > { %552 = vrot.lane.b32.xlu0 %v1750_v2, %s2061_s9  ;;  %611 = vrot.lane.b32.xlu1 %v1750_v2, %s2062_s10 }
  0x1d   : > { %670 = vrot.lane.b32.xlu0 %v1750_v2, %s2063_s11  ;;  %729 = vrot.lane.b32.xlu1 %v1750_v2, %s2064_s12 }
  0x21   : > { %784 = vperm.xlu1 %2016, %v780_v5   ;;  %789 = vperm.xlu0 %2015, %v781_v6  }
  0x25   : > { %2018 = vrot.lane.b32.xlu1 %v2055_v0, %s2066_s14  ;;  %2023 = vrot.lane.b32.xlu0 %v2055_v0, %s2067_s15 }
  0x29   : > { %2028 = vrot.lane.b32.xlu1 %v2055_v0, %s2068_s16  ;;  %2033 = vrot.lane.b32.xlu0 %v2055_v0, %s2069_s17 }
  0x83   : > { %v265_v8 = vpop.permute.xlu0 %264  ;;  %v435_v9 = vpop.permute.xlu1 %434 }
  0x84   : > { %v272_v10 = vsel %vm270_vm1, %v265_v8, 0  ;;  %v440_v12 = vsel %vm270_vm1, %v435_v9, 0 }
  0x85   : > { %1875 = vmatpush3.bf16.msra.mxu0 %v272_v10  ;;  %1893 = vmatpush3.bf16.msra.mxu1 %v440_v12 }
  0x86   : > { %1886 = vmatprep.subr.bf16.mxu0 %v2055_v0  ;;  %1904 = vmatprep.subr.bf16.mxu1 %v2055_v0 }
  0x87   : > { %v376_v14 = vpop.permute.xlu0 %375  ;;  %v494_v16 = vpop.permute.xlu1 %493 }
  0x88   : > { %1877 = vmatmul.mubr.msk.bf16.vlgmr.msra.gmra.mxu0 %vm266_vm2, %v2038_v11  ;;  %v381_v15 = vsel %vm270_vm1, %v376_v14, 0  ;;  %1895 = vmatmul.mubr.msk.bf16.vlgmr.msra.gmra.mxu1 %vm266_vm2, %v2040_v13  ;;  %v499_v21 = vsel %vm270_vm1, %v494_v16, 0 }
  0x89   : > { %1887 = vmatpush3.bf16.msra.mxu0 %v381_v15  ;;  %1888 = vmatprep.mubr.msk.bf16.mxu0 %vm2056_vm0, %v2055_v0 }
  0x8a   : > { %1898 = vmatprep.subr.bf16.mxu0 %v2055_v0  ;;  %1906 = vmatprep.mubr.msk.bf16.mxu1 %vm2056_vm0, %v2055_v0 }
  0x8b   : > { %v553_v17 = vpop.permute.xlu0 %552  ;;  %v612_v24 = vpop.permute.xlu1 %611 }
  0x8c   : > { %v558_v19 = vsel %vm270_vm1, %v553_v17, 0  ;;  %v617_v27 = vsel %vm270_vm1, %v612_v24, 0 }
  0x8d   : > { %1905 = vmatpush3.bf16.msra.mxu1 %v558_v19  ;;  %v1782_v19 = vld [vmem:[%s2348_s5] ss:$0 sm:$0xff] }
  0x8e   : > { %1916 = vmatprep.subr.bf16.mxu1 %v2055_v0 }
  0x8f   : > { %v671_v22 = vpop.permute.xlu0 %670  ;;  %v730_v28 = vpop.permute.xlu1 %729 }
  0x90   : > { %1889 = vmatmul.mubr.msk.bf16.vlgmr.msra.gmra.mxu0 %vm266_vm2, %v2041_v18  ;;  %1907 = vmatmul.mubr.msk.bf16.vlgmr.msra.gmra.mxu1 %vm266_vm2, %v2043_v20  ;;  %v676_v23 = vsel %vm270_vm1, %v671_v22, 0  ;;  %v735_v30 = vsel %vm270_vm1, %v730_v28, 0 }
  0x91   : > { %1899 = vmatpush3.bf16.msra.mxu0 %v499_v21  ;;  %1900 = vmatprep.mubr.msk.bf16.mxu0 %vm2056_vm0, %v2055_v0 }
  0x92   : > { %1910 = vmatprep.subr.bf16.mxu0 %v2055_v0  ;;  %1917 = vmatpush3.bf16.msra.mxu1 %v676_v23 }
  0x93   : > { %1918 = vmatprep.mubr.msk.bf16.mxu1 %vm2056_vm0, %v2055_v0 }
  0x98   : > { %1901 = vmatmul.mubr.msk.bf16.vlgmr.msra.gmra.mxu0 %vm266_vm2, %v2042_v25  ;;  %1919 = vmatmul.mubr.msk.bf16.vlgmr.msra.gmra.mxu1 %vm266_vm2, %v2045_v26 }
  0x99   : > { %1911 = vmatpush3.bf16.msra.mxu0 %v617_v27  ;;  %1912 = vmatprep.mubr.msk.bf16.mxu0 %vm2056_vm0, %v2055_v0 }
  0x9a   : > { %1922 = vmatprep.subr.bf16.mxu0 %v2055_v0 }
  0x9c   : > { %v785_v14 = vpop.permute.xlu1 %784  ;;  %v790_v21 = vpop.permute.xlu0 %789 }
  0xa0   : > { %1913 = vmatmul.mubr.msk.bf16.vlgmr.msra.gmra.mxu0 %vm266_vm2, %v2044_v29  ;;  %v1783_v29 = vld [vmem:[%s2346_s3 + $0x10] sm:$0xff] }
  0xa1   : > { %1923 = vmatpush3.bf16.msra.mxu0 %v735_v30  ;;  %1924 = vmatprep.mubr.msk.bf16.mxu0 %vm2056_vm0, %v2055_v0 }
  0xa2   : > { %1932 = vmatprep.mubr.msk.f32.mxu1 %vm838_vm4, %v1783_v29 }
  0xa8   : > { %1925 = vmatmul.mubr.msk.bf16.vlgmr.msra.gmra.mxu0 %vm266_vm2, %v2046_v31 }
  0xd3   : > { %v360_v32 = vpop.f32.mrf.mxu1 }
  0xd5   : > { %v1884_v33 = vpop.f32.mrf.mxu1 }
  0xd6   : > { %v1666_v33 = vld [vmem:[%s2347_s4] sm:$0xff] }
  0xd7   : > { %v363_v34 = vpop.f32.mrf.mxu1 }
  0xd9   : > { %v1885_v35 = vpop.f32.mrf.mxu1 }
  0xda   : > { %v2019_v35 = vpop.permute.xlu1 %2018 }
 0x148   : > { %v308_v36 = vpop.f32.mrf.mxu0  ;;  %v476_v37 = vpop.f32.mrf.mxu1 }
 0x149   : > { %v361_v50 = vadd.f32 %v360_v32, %v308_v36  ;;  %v1789_v32 = vld [vmem:[%s2346_s3 + $0x20] sm:$0xff]  ;;  %v2024_v36 = vpop.permute.xlu0 %2023 }
 0x14a   : > { %v1878_v38 = vpop.f32.mrf.mxu0  ;;  %v1896_v39 = vpop.f32.mrf.mxu1  ;;  %1946 = vmatprep.mubr.msk.f32.mxu0 %vm838_vm4, %v1789_v32 }
 0x14c   : > { %v311_v40 = vpop.f32.mrf.mxu0  ;;  %v479_v41 = vpop.f32.mrf.mxu1 }
 0x14d   : > { %v364_v56 = vadd.f32 %v363_v34, %v311_v40  ;;  %v1667_v34 = vld [vmem:[%s2347_s4 + $0x8] sm:$0xff]  ;;  %v2034_v38 = vpop.permute.xlu0 %2033 }
 0x14e   : > { %v1879_v42 = vpop.f32.mrf.mxu0  ;;  %v1897_v43 = vpop.f32.mrf.mxu1 }
 0x150   : > { %v417_v44 = vpop.f32.mrf.mxu0  ;;  %v594_v45 = vpop.f32.mrf.mxu1 }
 0x151   : > { %v424_v53 = vadd.f32 %v417_v44, %v361_v50  ;;  %v2021_v44 = vunpack.i.h.bf16 %v2019_v35 }
 0x152   : > { %v1890_v46 = vpop.f32.mrf.mxu0  ;;  %v1908_v47 = vpop.f32.mrf.mxu1 }
 0x153   : > { %v483_v59 = vadd.f32 %v476_v37, %v424_v53  ;;  %v2029_v37 = vpop.permute.xlu1 %2028  ;;  %v2025_v46 = vunpack.i.l.bf16 %v2024_v36 }
 0x154   : > { %v420_v48 = vpop.f32.mrf.mxu0  ;;  %v597_v49 = vpop.f32.mrf.mxu1 }
 0x155   : > { %v425_v60 = vadd.f32 %v420_v48, %v364_v56  ;;  %v1784_v48 = vld [vmem:[%s2346_s3 + $0x18] sm:$0xff] }
 0x156   : > { %v1891_v51 = vpop.f32.mrf.mxu0  ;;  %v1909_v52 = vpop.f32.mrf.mxu1 }
 0x157   : > { %v484_v2 = vadd.f32 %v479_v41, %v425_v60  ;;  %v2020_v41 = vunpack.i.l.bf16 %v2019_v35  ;;  %v816_v51 = vld [vmem:[%s2346_s3] sm:$0xff]  ;;  %v2026_v52 = vunpack.i.h.bf16 %v2024_v36  ;;  %v2031_v60 = vunpack.i.h.bf16 %v2029_v37 }
 0x158   : > { %v535_v54 = vpop.f32.mrf.mxu0  ;;  %v712_v55 = vpop.f32.mrf.mxu1 }
 0x159   : > { %v542_v63 = vadd.f32 %v535_v54, %v483_v59  ;;  %v2030_v54 = vunpack.i.l.bf16 %v2029_v37  ;;  %v817_v59 = vld [vmem:[%s2346_s3 + $0x8] sm:$0xff] }
 0x15a   : > { %v1902_v57 = vpop.f32.mrf.mxu0  ;;  %v1920_v58 = vpop.f32.mrf.mxu1 }
 0x15b   : > { %v601_v4 = vadd.f32 %v594_v45, %v542_v63  ;;  %v2036_v63 = vunpack.i.h.bf16 %v2034_v38 }
 0x15c   : > { %v538_v61 = vpop.f32.mrf.mxu0  ;;  %v715_v62 = vpop.f32.mrf.mxu1 }
 0x15d   : > { %v543_v5 = vadd.f32 %v538_v61, %v484_v2 }
 0x15e   : > { %v1903_v0 = vpop.f32.mrf.mxu0  ;;  %v1921_v1 = vpop.f32.mrf.mxu1 }
 0x15f   : > { %v602_v9 = vadd.f32 %v597_v49, %v543_v5  ;;  %v1790_v1 = vld [vmem:[%s2346_s3 + $0x28] sm:$0xff]  ;;  %v1793_v5 = vld [vmem:[%s2346_s3 + $0x30] sm:$0xff] }
 0x160   : > { %v653_v3 = vpop.f32.mrf.mxu0 }
 0x161   : > { %v660_v7 = vadd.f32 %v653_v3, %v601_v4 }
 0x162   : > { %v1914_v6 = vpop.f32.mrf.mxu0 }
 0x163   : > { %v719_v11 = vadd.f32 %v712_v55, %v660_v7  ;;  %v2035_v55 = vunpack.i.l.bf16 %v2034_v38  ;;  %v1794_v6 = vld [vmem:[%s2346_s3 + $0x38] sm:$0xff] }
 0x164   : > { %v656_v8 = vpop.f32.mrf.mxu0 }
 0x165   : > { %v661_v12 = vadd.f32 %v656_v8, %v602_v9  ;;  %v1797_v9 = vld [vmem:[%s2346_s3 + $0x40] sm:$0xff] }
 0x166   : > { %v1915_v10 = vpop.f32.mrf.mxu0 }
 0x167   : > { %v720_v17 = vadd.f32 %v715_v62, %v661_v12  ;;  %v1798_v10 = vld [vmem:[%s2346_s3 + $0x48] sm:$0xff]  ;;  %v1802_v12 = vld [vmem:[%s2346_s3 + $0x58] sm:$0xff] }
 0x168   : > { %v771_v13 = vpop.f32.mrf.mxu0 }
 0x169   : > { %v778_v15 = vadd.f32 %v771_v13, %v719_v11  ;;  %v1801_v11 = vld [vmem:[%s2346_s3 + $0x50] sm:$0xff] }
 0x16a   : > { %v1926_v16 = vpop.f32.mrf.mxu0 }
 0x16b   : > { %v792_v18 = vadd.f32 %v785_v14, %v778_v15  ;;  %v1805_v14 = vld [vmem:[%s2346_s3 + $0x60] sm:$0xff]  ;;  %v1806_v16 = vld [vmem:[%s2346_s3 + $0x68] sm:$0xff] }
 0x16c   : > { %v774_v20 = vpop.f32.mrf.mxu0 }
 0x16d   : > { %v794_v22 = vmax.f32 %v792_v18, 0.0  ;;  %v779_v23 = vadd.f32 %v774_v20, %v720_v17  ;;  %v1809_v17 = vld [vmem:[%s2346_s3 + $0x70] sm:$0xff]  ;;  %v1813_v20 = vld [vmem:[%s2346_s3 + $0x80] sm:$0xff] }
 0x16e   : > { %v1927_v24 = vpop.f32.mrf.mxu0 }
 0x16f   : > { %v803_v25 = vmul.f32 %v1782_v19, %v794_v22  ;;  %v793_v26 = vadd.f32 %v790_v21, %v779_v23  ;;  %v1814_v22 = vld [vmem:[%s2346_s3 + $0x88] sm:$0xff] }
 0x171   : > { %810 = vst.msk [vmem:[#allocation2 + $0x8] sm:$0xff] %vm809_vm3, %v803_v25  ;;  %v795_v27 = vmax.f32 %v793_v26, 0.0 }
 0x173   : > { %v804_v28 = vmul.f32 %v1782_v19, %v795_v27  ;;  %v1810_v19 = vld [vmem:[%s2346_s3 + $0x78] sm:$0xff] }
 0x175   : > { %811 = vst.msk [vmem:[#allocation2 + $0x18] sm:$0xff] %vm809_vm3, %v804_v28 }
 0x178   : > { %v2220_v30 = vld [vmem:[#allocation2 + $0x8] sm:$0xff] }
 0x179   : > { %922 = vrot.lane.b32.xlu0 %v2220_v30, %s2067_s15  ;;  %827 = vrot.lane.b32.xlu1 %v2220_v30, %s2066_s14 }
 0x17c   : > { %v2226_v31 = vld [vmem:[#allocation2 + $0x18] sm:$0xff] }
 0x17d   : > { %1019 = vrot.lane.b32.xlu1 %v2220_v30, %s2068_s16  ;;  %831 = vrot.lane.b32.xlu0 %v2226_v31, %s2066_s14 }
 0x181   : > { %926 = vrot.lane.b32.xlu1 %v2226_v31, %s2067_s15  ;;  %1118 = vrot.lane.b32.xlu0 %v2220_v30, %s2069_s17 }
 0x185   : > { %1122 = vrot.lane.b32.xlu1 %v2226_v31, %s2069_s17  ;;  %1023 = vrot.lane.b32.xlu0 %v2226_v31, %s2068_s16  ;;  %s1819_s17 = sshll.u32 %s2351_s22, 4 }
 0x186   : > { %s248_s20 = scalar_lea.vmem %s2349_s6, %s1819_s17 }
 0x189   : > { %1303 = vrot.lane.b32.xlu1 %v2226_v31, %s2057_s29  ;;  %1301 = vrot.lane.b32.xlu0 %v2220_v30, %s2057_s29 }
 0x18d   : > { %1395 = vrot.lane.b32.xlu1 %v2226_v31, %s2070_s26  ;;  %1393 = vrot.lane.b32.xlu0 %v2220_v30, %s2070_s26 }
 0x191   : > { %1487 = vrot.lane.b32.xlu1 %v2226_v31, %s2058_s30  ;;  %1485 = vrot.lane.b32.xlu0 %v2220_v30, %s2058_s30 }
 0x195   : > { %1579 = vrot.lane.b32.xlu1 %v2226_v31, %s2060_s8  ;;  %1577 = vrot.lane.b32.xlu0 %v2220_v30, %s2060_s8 }
 0x199   : > { %1670 = vperm.xlu1 %2016, %v1666_v33   ;;  %1675 = vperm.xlu0 %2015, %v1667_v34  }
 0x1eb   : > { %v828_v39 = vpop.permute.xlu1 %827  ;;  %v923_v40 = vpop.permute.xlu0 %922 }
 0x1ec   : > { %v834_v47 = vsel %vm833_vm5, %v2021_v44, %v828_v39  ;;  %v929_v56 = vsel %vm928_vm6, %v2026_v52, %v923_v40 }
 0x1ef   : > { %v1020_v42 = vpop.permute.xlu1 %1019  ;;  %v832_v43 = vpop.permute.xlu0 %831 }
 0x1f0   : > { %v835_v45 = vsel %vm833_vm5, %v2020_v41, %v832_v43  ;;  %v1026_v0 = vsel %vm1025_vm7, %v2031_v60, %v1020_v42 }
 0x1f1   : > { %1928 = vmatprep.subr.mxu1 %v835_v45 }
 0x1f2   : > { %1929 = vmatpush3.msra.mxu1 %v835_v45 }
 0x1f3   : > { %v927_v49 = vpop.permute.xlu1 %926  ;;  %1930 = vmatprep.subr.mxu1 %v834_v47  ;;  %v1119_v50 = vpop.permute.xlu0 %1118 }
 0x1f4   : > { %1931 = vmatpush3.msra.mxu1 %v834_v47  ;;  %v930_v53 = vsel %vm928_vm6, %v2025_v46, %v927_v49  ;;  %v1125_v4 = vsel %vm1124_vm8, %v2036_v63, %v1119_v50 }
 0x1f5   : > { %1935 = vmatprep.subr.mxu1 %v930_v53  ;;  %1933 = vmatmul.mubr.msk.f32.vlgmr.msra.gmra.mxu1 %vm838_vm4, %v1784_v48 }
 0x1f6   : > { %1936 = vmatpush3.msra.mxu1 %v930_v53  ;;  %1939 = vmatprep.mubr.msk.f32.mxu1 %vm838_vm4, %v816_v51 }
 0x1f7   : > { %v1123_v57 = vpop.permute.xlu1 %1122  ;;  %v1024_v58 = vpop.permute.xlu0 %1023  ;;  %1937 = vmatprep.subr.mxu1 %v929_v56 }
 0x1f8   : > { %1938 = vmatpush3.msra.mxu1 %v929_v56  ;;  %v1027_v61 = vsel %vm1025_vm7, %v2030_v54, %v1024_v58  ;;  %v1126_v62 = vsel %vm1124_vm8, %v2035_v55, %v1123_v57 }
 0x1f9   : > { %1942 = vmatprep.subr.mxu0 %v1027_v61  ;;  %1949 = vmatprep.subr.mxu1 %v1126_v62 }
 0x1fa   : > { %1940 = vmatmul.mubr.msk.f32.vlgmr.msra.gmra.mxu1 %vm838_vm4, %v817_v59  ;;  %1943 = vmatpush3.msra.mxu0 %v1027_v61 }
 0x1fb   : > { %1950 = vmatpush3.msra.mxu1 %v1126_v62  ;;  %v1304_v2 = vpop.permute.xlu1 %1303  ;;  %1944 = vmatprep.subr.mxu0 %v1026_v0  ;;  %v1302_v3 = vpop.permute.xlu0 %1301 }
 0x1fc   : > { %1951 = vmatprep.subr.mxu1 %v1125_v4  ;;  %1945 = vmatpush3.msra.mxu0 %v1026_v0 }
 0x1fd   : > { %1952 = vmatpush3.msra.mxu1 %v1125_v4  ;;  %1947 = vmatmul.mubr.msk.f32.vlgmr.msra.gmra.mxu0 %vm838_vm4, %v1790_v1 }
 0x1fe   : > { %1953 = vmatprep.mubr.msk.f32.mxu1 %vm838_vm4, %v1793_v5  ;;  %1956 = vmatprep.subr.mxu0 %v2226_v31 }
 0x1ff   : > { %1963 = vmatprep.subr.mxu1 %v1304_v2  ;;  %1954 = vmatmul.mubr.msk.f32.vlgmr.msra.gmra.mxu1 %vm838_vm4, %v1794_v6  ;;  %v1396_v7 = vpop.permute.xlu1 %1395  ;;  %v1394_v8 = vpop.permute.xlu0 %1393 }
 0x200   : > { %1957 = vmatpush3.msra.mxu0 %v2226_v31  ;;  %1964 = vmatpush3.msra.mxu1 %v1304_v2 }
 0x201   : > { %1958 = vmatprep.subr.mxu0 %v2220_v30  ;;  %1965 = vmatprep.subr.mxu1 %v1302_v3 }
 0x202   : > { %1959 = vmatpush3.msra.mxu0 %v2220_v30  ;;  %1960 = vmatprep.mubr.msk.f32.mxu0 %vm838_vm4, %v1797_v9 }
 0x203   : > { %1966 = vmatpush3.msra.mxu1 %v1302_v3  ;;  %1961 = vmatmul.mubr.msk.f32.vlgmr.msra.gmra.mxu0 %vm838_vm4, %v1798_v10  ;;  %v1488_v13 = vpop.permute.xlu1 %1487  ;;  %v1486_v15 = vpop.permute.xlu0 %1485 }
 0x204   : > { %1970 = vmatprep.subr.mxu0 %v1396_v7  ;;  %1967 = vmatprep.mubr.msk.f32.mxu1 %vm838_vm4, %v1801_v11 }
 0x205   : > { %1971 = vmatpush3.msra.mxu0 %v1396_v7  ;;  %1968 = vmatmul.mubr.msk.f32.vlgmr.msra.gmra.mxu1 %vm838_vm4, %v1802_v12 }
 0x206   : > { %1972 = vmatprep.subr.mxu0 %v1394_v8  ;;  %1974 = vmatprep.mubr.msk.f32.mxu0 %vm838_vm4, %v1805_v14 }
 0x207   : > { %1973 = vmatpush3.msra.mxu0 %v1394_v8  ;;  %1977 = vmatprep.subr.mxu1 %v1488_v13  ;;  %v1580_v18 = vpop.permute.xlu1 %1579  ;;  %v1578_v21 = vpop.permute.xlu0 %1577 }
 0x208   : > { %1975 = vmatmul.mubr.msk.f32.vlgmr.msra.gmra.mxu0 %vm838_vm4, %v1806_v16  ;;  %1978 = vmatpush3.msra.mxu1 %v1488_v13 }
 0x209   : > { %1979 = vmatprep.subr.mxu1 %v1486_v15  ;;  %1981 = vmatprep.mubr.msk.f32.mxu1 %vm838_vm4, %v1809_v17 }
 0x20a   : > { %1980 = vmatpush3.msra.mxu1 %v1486_v15  ;;  %1984 = vmatprep.subr.mxu0 %v1580_v18 }
 0x20b   : > { %1982 = vmatmul.mubr.msk.f32.vlgmr.msra.gmra.mxu1 %vm838_vm4, %v1810_v19  ;;  %1985 = vmatpush3.msra.mxu0 %v1580_v18 }
 0x20c   : > { %1986 = vmatprep.subr.mxu0 %v1578_v21  ;;  %1988 = vmatprep.mubr.msk.f32.mxu0 %vm838_vm4, %v1813_v20 }
 0x20d   : > { %1987 = vmatpush3.msra.mxu0 %v1578_v21 }
 0x20e   : > { %1989 = vmatmul.mubr.msk.f32.vlgmr.msra.gmra.mxu0 %vm838_vm4, %v1814_v22 }
 0x214   : > { %v1676_v55 = vpop.permute.xlu0 %1675  ;;  %v1671_v59 = vpop.permute.xlu1 %1670 }
 0x2b5   : > { %v1934_v23 = vpop.f32.mrf.mxu1 }
 0x2b7   : > { %v911_v24 = vpop.f32.mrf.mxu1 }
 0x2ba   : > { %v1941_v25 = vpop.f32.mrf.mxu1 }
 0x2bb   : > { %v1011_v26 = vadd.f32 %v1941_v25, %v1934_v23 }
 0x2bc   : > { %v1005_v27 = vpop.f32.mrf.mxu1 }
 0x2bd   : > { %v1948_v28 = vpop.f32.mrf.mxu0  ;;  %v1006_v29 = vadd.f32 %v1005_v27, %v911_v24 }
 0x2be   : > { %v1112_v30 = vadd.f32 %v1948_v28, %v1011_v26 }
 0x2bf   : > { %v1102_v31 = vpop.f32.mrf.mxu0  ;;  %v1955_v32 = vpop.f32.mrf.mxu1 }
 0x2c0   : > { %v1111_v33 = vadd.f32 %v1102_v31, %v1006_v29  ;;  %v1211_v34 = vadd.f32 %v1955_v32, %v1112_v30 }
 0x2c1   : > { %v1201_v35 = vpop.f32.mrf.mxu1 }
 0x2c2   : > { %v1210_v36 = vadd.f32 %v1201_v35, %v1111_v33 }
 0x2c3   : > { %v1962_v37 = vpop.f32.mrf.mxu0 }
 0x2c4   : > { %v1297_v38 = vadd.f32 %v1962_v37, %v1211_v34 }
 0x2c5   : > { %v1287_v39 = vpop.f32.mrf.mxu0  ;;  %v1969_v40 = vpop.f32.mrf.mxu1 }
 0x2c6   : > { %v1296_v41 = vadd.f32 %v1287_v39, %v1210_v36  ;;  %v1389_v42 = vadd.f32 %v1969_v40, %v1297_v38 }
 0x2c7   : > { %v1379_v43 = vpop.f32.mrf.mxu1 }
 0x2c8   : > { %v1388_v44 = vadd.f32 %v1379_v43, %v1296_v41  ;;  %v1976_v45 = vpop.f32.mrf.mxu0 }
 0x2c9   : > { %v1481_v46 = vadd.f32 %v1976_v45, %v1389_v42 }
 0x2ca   : > { %v1471_v47 = vpop.f32.mrf.mxu0 }
 0x2cb   : > { %v1480_v48 = vadd.f32 %v1471_v47, %v1388_v44  ;;  %v1983_v49 = vpop.f32.mrf.mxu1 }
 0x2cc   : > { %v1573_v50 = vadd.f32 %v1983_v49, %v1481_v46 }
 0x2cd   : > { %v1563_v51 = vpop.f32.mrf.mxu1 }
 0x2ce   : > { %v1990_v52 = vpop.f32.mrf.mxu0  ;;  %v1572_v53 = vadd.f32 %v1563_v51, %v1480_v48 }
 0x2cf   : > { %v1665_v54 = vadd.f32 %v1990_v52, %v1573_v50 }
 0x2d0   : > { %v1655_v56 = vpop.f32.mrf.mxu0 }
 0x2d1   : > { %v1679_v57 = vadd.f32 %v1676_v55, %v1665_v54  ;;  %v1664_v58 = vadd.f32 %v1655_v56, %v1572_v53 }
 0x2d3   : > { %v1681_v60 = vmax.f32 %v1679_v57, 0.0  ;;  %v1678_v61 = vadd.f32 %v1671_v59, %v1664_v58 }
 0x2d5   : > { %1683 = vst.msk [vmem:[%s248_s20 + $0x8] sm:$0xff] %vm809_vm3, %v1681_v60  ;;  %v1680_v62 = vmax.f32 %v1678_v61, 0.0 }
 0x2d7   : > { %1682 = vst.msk [vmem:[%s248_s20] sm:$0xff] %vm809_vm3, %v1680_v62 }
 0x2d8 PF: > { %s16_s21 = sadd.s32 1, %s2053_s21  }
 0x2d9   : > { %p13_p4 = scmp.ge.s32.totalorder %s16_s21, 4  }
 0x2db   :  { %15 = sbr.rel (!%p13_p4) target bundleno = 1 (0x1), region = 90 }

// kernel: a_call__.2
= control target key start
LH: loop header
LB: loop body
LE: loop exit
PB: predicated region body
PF: predicated region fallthrough
CT: control target
= control target key end

     0   :  { %s3209_s21 = smov 0   ;;  %s3565_s0 = inlined_call_operand.vmem [shape: bf16[2,4,384], index: 0, kind: input, shape index: {}]   ;;  %s3566_s1 = inlined_call_operand.vmem [shape: bf16[9,8,4], index: 1, kind: input, shape index: {}]   ;;  %s3567_s2 = inlined_call_operand.vmem [shape: f32[8,1], index: 2, kind: input, shape index: {}]   ;;  %s3568_s3 = inlined_call_operand.vmem [shape: f32[9,8,8], index: 3, kind: input, shape index: {}]   ;;  %s3569_s4 = inlined_call_operand.vmem [shape: f32[8,1], index: 4, kind: input, shape index: {}]   ;;  %s3570_s5 = inlined_call_operand.vmem [shape: f32[1,288], index: 5, kind: input, shape index: {}]   ;;  %s3571_s6 = inlined_call_operand.vmem [shape: f32[2,8,288], index: 6, kind: output, shape index: {}]  }
   0x1 LB: > { %s2907_s22 = sadd.s32 4294967295, %s3155_s21   ;;  %p2911_p0 = scmp.ge.s32.totalorder %s3155_s21, 1  ;;  %s3155_s21 = sphi %s3209_s21, %s16_s21  }
   0x2   : > { %p212_p1 = scmp.lt.s32.totalorder %s3155_s21, 3 }
   0x4   : > { %p213_p2 = pnand %p2911_p0, %p212_p1 }
   0x5   : > { %p242_p3 = scmp.lt.s32.totalorder (!%p213_p2), %s2907_s22, 1  ;;  %s3161_s27 = smov (!%p213_p2), 127  }
   0x6   : > { %216 = sbr.rel (%p213_p2) target bundleno = 787 (0x313), region = 44  ;;  %s3162_s28 = smov (!%p213_p2), 126  }
   0x7   : > { %s3163_s29 = smov (!%p213_p2), 110   ;;  %s3164_s30 = smov (!%p213_p2), 109  }
   0x8   : > { %s3165_s7 = smov (!%p213_p2), 108   ;;  %s3166_s8 = smov (!%p213_p2), 92  }
   0x9   : > { %s3167_s9 = smov (!%p213_p2), 91   ;;  %s3168_s10 = smov (!%p213_p2), 90  }
   0xa   : > { %s3169_s12 = smov (!%p213_p2), 18   ;;  %s3170_s13 = smov (!%p213_p2), 19  }
   0xb   : > { %v262_v0 = vlaneseq  ;;  %v3157_v1 = vmov 1983009808   ;;  %v3158_v3 = vmov 0.0   ;;  %s3573_s22 = smov (!%p242_p3, %s2907_s22), 1  ;;  %vm3159_vm0 = vmmov 0   ;;  %v1346_v48 = vld [vmem:[%s3567_s2] sm:$0xff] }
   0xc   : > { %v260_v2 = vunpack.c.l.s4 %v3157_v1  ;;  %3013 = vmatprep.subr.bf16.mxu1 %v3158_v3  ;;  %1378 = vst [vmem:[#allocation2] sm:$0xff] %v3158_v3  ;;  %1381 = vst [vmem:[#allocation2 + $0x18] sm:$0xff] %v3158_v3  ;;  %3015 = vmatprep.mubr.msk.bf16.mxu1 %vm3159_vm0, %v3158_v3  ;;  %s3112_s23 = smul.u32 6, %s3573_s22  ;;  %v3160_v6 = vmov 0   ;;  %vm287_vm1 = vcmask 1041408   ;;  %vm280_vm2 = vcmask 1039360  }
   0xd   : > { %v3222_v4 = vshrl.u32 %v262_v0, 7  ;;  %329 = vmatprep.mubr.bf16.mxu0 %v3160_v6  ;;  %3139 = vset.pattern.permute.xlu0 %v3160_v6  ;;  %v2914_v53 = vld [vmem:[%s3566_s1 + $0x4] sm:$0xf]  ;;  %vm283_vm3 = vcmask 31744   ;;  %vm497_vm4 = vcmask 1031168   ;;  %vm622_vm5 = vcmask 900096  }
   0xe   : > { %v261_v5 = vunpack.c.0.s8 %v260_v2  ;;  %s3235_s26 = scalar_lea.vmem %s3565_s0, %s3112_s23  ;;  %v254_v63 = vld [vmem:[%s3566_s1] sm:$0xf]  ;;  %vm747_vm6 = vcmask 891904   ;;  %vm872_vm7 = vcmask 883712   ;;  %vm997_vm8 = vcmask 752640   ;;  %s3171_s14 = smov 17  }
   0xf   : > { %v253_v8 = vld [vmem:[%s3235_s26] sm:$0x3f]  ;;  %vm1122_vm9 = vcmask 744448   ;;  %vm1247_vm10 = vcmask 736256   ;;  %s3172_s15 = smov 1   ;;  %vm1384_vm11 = vcmask 261120  }
  0x10   : > { %v3230_v7 = vsub.s32 %v261_v5, %v3222_v4  ;;  %v471_v9 = vld [vmem:[%s3235_s26] sm:$0x3f]  ;;  %v258_v11 = vcombine.high %v253_v8, %v253_v8  ;;  %s3173_s18 = smov 111   ;;  %vm1405_vm12 = vcmask 146432   ;;  %vm1412_vm13 = vcmask 64512   ;;  %s3113_s17 = smul.u32 24, %s3573_s22 }
  0x11   : > { %v475_v15 = vcombine.high %v471_v9, %v471_v9  ;;  %v596_v16 = vld [vmem:[%s3235_s26] sm:$0x3f]  ;;  %vm1565_vm14 = vcmask 154624   ;;  %vm1726_vm15 = vcmask 138240  }
  0x12   : > { %v3240_v10 = vrot.slane %v253_v8, %v3230_v7  ;;  %v3245_v12 = vrot.slane %v258_v11, %v3230_v7  ;;  %v482_v14 = vrot.slane %v471_v9, %v3230_v7  ;;  %v607_v19 = vrot.slane %v596_v16, %v3230_v7  ;;  %v721_v21 = vld [vmem:[%s3235_s26] sm:$0x3f]  ;;  %v2921_v11 = vld [vmem:[%s3566_s1 + $0x8] sm:$0xf]  ;;  %s251_s20 = scalar_lea.vmem %s3571_s6, %s3113_s17 }
  0x13   : > { %v489_v18 = vrot.slane %v475_v15, %v3230_v7  ;;  %v600_v20 = vcombine.high %v596_v16, %v596_v16  ;;  %v732_v24 = vrot.slane %v721_v21, %v3230_v7  ;;  %v725_v25 = vcombine.high %v721_v21, %v721_v21  ;;  %v846_v26 = vld [vmem:[%s3235_s26] sm:$0x3f] }
  0x14   : > { %274 = vrot.lane.b32.xlu0 %v3240_v10, %s3161_s27  ;;  %v3249_v13 = vcombine.high %v3240_v10, %v3240_v10  ;;  %278 = vrot.lane.b32.xlu1 %v3245_v12, %s3161_s27  ;;  %v490_v17 = vcombine.high %v482_v14, %v482_v14  ;;  %v615_v22 = vcombine.high %v607_v19, %v607_v19  ;;  %v971_v31 = vld [vmem:[%s3235_s26] sm:$0x3f]  ;;  %v388_v56 = vsel %vm287_vm1, %v3245_v12, 0 }
  0x15   : > { %v614_v23 = vrot.slane %v600_v20, %v3230_v7  ;;  %v740_v27 = vcombine.high %v732_v24, %v732_v24  ;;  %v739_v28 = vrot.slane %v725_v25, %v3230_v7  ;;  %v857_v29 = vrot.slane %v846_v26, %v3230_v7  ;;  %v1096_v36 = vld [vmem:[%s3235_s26] sm:$0x3f]  ;;  %v2925_v20 = vld [vmem:[%s3566_s1 + $0xc] sm:$0xf] }
  0x16   : > { %v850_v30 = vcombine.high %v846_v26, %v846_v26  ;;  %v982_v34 = vrot.slane %v971_v31, %v3230_v7  ;;  %v975_v35 = vcombine.high %v971_v31, %v971_v31  ;;  %v1107_v39 = vrot.slane %v1096_v36, %v3230_v7  ;;  %v1221_v41 = vld [vmem:[%s3235_s26] sm:$0x3f] }
  0x17   : > { %v865_v32 = vcombine.high %v857_v29, %v857_v29  ;;  %v1100_v40 = vcombine.high %v1096_v36, %v1096_v36  ;;  %v1232_v44 = vrot.slane %v1221_v41, %v3230_v7  ;;  %v1225_v45 = vcombine.high %v1221_v41, %v1221_v41  ;;  %v2933_v36 = vld [vmem:[%s3566_s1 + $0x14] sm:$0xf] }
  0x18   : > { %276 = vrot.lane.b32.xlu0 %v3249_v13, %s3161_s27  ;;  %491 = vrot.lane.b32.xlu1 %v482_v14, %s3162_s28  ;;  %v864_v33 = vrot.slane %v850_v30, %v3230_v7  ;;  %v990_v37 = vcombine.high %v982_v34, %v982_v34  ;;  %v989_v38 = vrot.slane %v975_v35, %v3230_v7  ;;  %v382_v60 = vsel %vm287_vm1, %v3240_v10, 0 }
  0x19   : > { %v1115_v42 = vcombine.high %v1107_v39, %v1107_v39  ;;  %v1114_v43 = vrot.slane %v1100_v40, %v3230_v7  ;;  %v1240_v46 = vcombine.high %v1232_v44, %v1232_v44  ;;  %v1239_v47 = vrot.slane %v1225_v45, %v3230_v7 }
  0x1c   : > { %493 = vrot.lane.b32.xlu0 %v490_v17, %s3162_s28  ;;  %495 = vrot.lane.b32.xlu1 %v489_v18, %s3162_s28 }
  0x20   : > { %616 = vrot.lane.b32.xlu0 %v607_v19, %s3163_s29  ;;  %618 = vrot.lane.b32.xlu1 %v615_v22, %s3163_s29 }
  0x24   : > { %620 = vrot.lane.b32.xlu0 %v614_v23, %s3163_s29  ;;  %741 = vrot.lane.b32.xlu1 %v732_v24, %s3164_s30 }
  0x28   : > { %743 = vrot.lane.b32.xlu0 %v740_v27, %s3164_s30  ;;  %745 = vrot.lane.b32.xlu1 %v739_v28, %s3164_s30  ;;  %v2929_v28 = vld [vmem:[%s3566_s1 + $0x10] sm:$0xf] }
  0x2c   : > { %866 = vrot.lane.b32.xlu0 %v857_v29, %s3165_s7  ;;  %868 = vrot.lane.b32.xlu1 %v865_v32, %s3165_s7 }
  0x30   : > { %870 = vrot.lane.b32.xlu0 %v864_v33, %s3165_s7  ;;  %991 = vrot.lane.b32.xlu1 %v982_v34, %s3166_s8 }
  0x34   : > { %993 = vrot.lane.b32.xlu0 %v990_v37, %s3166_s8  ;;  %995 = vrot.lane.b32.xlu1 %v989_v38, %s3166_s8 }
  0x38   : > { %1116 = vrot.lane.b32.xlu0 %v1107_v39, %s3167_s9  ;;  %1118 = vrot.lane.b32.xlu1 %v1115_v42, %s3167_s9 }
  0x3c   : > { %1120 = vrot.lane.b32.xlu0 %v1114_v43, %s3167_s9  ;;  %1241 = vrot.lane.b32.xlu1 %v1232_v44, %s3168_s10  ;;  %v2937_v43 = vld [vmem:[%s3566_s1 + $0x18] sm:$0xf] }
  0x40   : > { %1243 = vrot.lane.b32.xlu0 %v1240_v46, %s3168_s10  ;;  %1245 = vrot.lane.b32.xlu1 %v1239_v47, %s3168_s10 }
  0x44   : > { %1349 = vperm.xlu0 %3139, %v1346_v48  }
  0x48   : > { %1397 = vrot.lane.b32.xlu0 %v3158_v3, %s3169_s12 }
  0x4c   : > { %1557 = vrot.lane.b32.xlu0 %v3158_v3, %s3170_s13 }
  0x50   : > { %1718 = vrot.lane.b32.xlu0 %v3158_v3, %s3171_s14 }
  0x54   : > { %1882 = vrot.lane.b32.xlu0 %v3158_v3, %s3172_s15 }
  0x86   : > { %v275_v49 = vpop.permute.xlu0 %274  ;;  %v279_v50 = vpop.permute.xlu1 %278 }
  0x87   : > { %v295_v51 = vsel %vm287_vm1, %v279_v50, 0 }
  0x88   : > { %3014 = vmatpush3.bf16.msra.mxu1 %v295_v51 }
  0x89   : > { %3019 = vmatprep.subr.bf16.mxu1 %v3158_v3 }
  0x8a   : > { %v277_v52 = vpop.permute.xlu0 %276  ;;  %v492_v58 = vpop.permute.xlu1 %491 }
  0x8b   : > { %v282_v54 = vsel %vm280_vm2, %v277_v52, %v279_v50  ;;  %v281_v55 = vsel %vm280_vm2, %v275_v49, %v277_v52  ;;  %3016 = vmatmul.mubr.msk.bf16.vlgmr.msra.gmra.mxu1 %vm283_vm3, %v2914_v53  ;;  %v2941_v50 = vld [vmem:[%s3566_s1 + $0x1c] sm:$0xf] }
  0x8c   : > { %2915 = vmatprep.subr.msk.bf16.mxu0 %vm287_vm1, %v282_v54  ;;  %v289_v57 = vsel %vm287_vm1, %v281_v55, 0  ;;  %3020 = vmatpush3.bf16.msra.mxu1 %v388_v56  ;;  %v2945_v54 = vld [vmem:[%s3566_s1 + $0x20] sm:$0xf] }
  0x8d   : > { %312 = vmatpush1.bf16.msra.mxu0 %v289_v57  ;;  %3021 = vmatprep.mubr.msk.bf16.mxu1 %vm3159_vm0, %v3158_v3 }
  0x8e   : > { %v494_v59 = vpop.permute.xlu0 %493  ;;  %2918 = vmatprep.subr.msk.bf16.mxu0 %vm287_vm1, %v3249_v13  ;;  %3025 = vmatprep.subr.bf16.mxu1 %v3158_v3  ;;  %v496_v61 = vpop.permute.xlu1 %495 }
  0x8f   : > { %v499_v62 = vsel %vm497_vm4, %v494_v59, %v496_v61  ;;  %v498_v1 = vsel %vm497_vm4, %v492_v58, %v494_v59  ;;  %v510_v2 = vsel %vm287_vm1, %v496_v61, 0 }
  0x90   : > { %2916 = vmatmul.mubr.msk.bf16.vlgmr.msra.gmra.mxu0 %vm283_vm3, %v2914_v53  ;;  %v504_v7 = vsel %vm287_vm1, %v498_v1, 0 }
  0x91   : > { %405 = vmatpush1.bf16.msra.mxu0 %v382_v60  ;;  %422 = vmatprep.mubr.bf16.mxu0 %v3160_v6 }
  0x92   : > { %2922 = vmatprep.subr.msk.bf16.mxu0 %vm287_vm1, %v499_v62  ;;  %v617_v0 = vpop.permute.xlu0 %616  ;;  %v619_v5 = vpop.permute.xlu1 %618 }
  0x93   : > { %3022 = vmatmul.mubr.msk.bf16.vlgmr.msra.gmra.mxu1 %vm283_vm3, %v254_v63  ;;  %v623_v13 = vsel %vm622_vm5, %v617_v0, %v619_v5 }
  0x94   : > { %3026 = vmatpush3.bf16.msra.mxu1 %v510_v2  ;;  %3027 = vmatprep.mubr.msk.bf16.mxu1 %vm3159_vm0, %v3158_v3  ;;  %v629_v16 = vsel %vm287_vm1, %v623_v13, 0 }
  0x95   : > { %3031 = vmatprep.subr.bf16.mxu1 %v3158_v3 }
  0x96   : > { %v621_v8 = vpop.permute.xlu0 %620  ;;  %v742_v10 = vpop.permute.xlu1 %741 }
  0x97   : > { %v624_v9 = vsel %vm622_vm5, %v619_v5, %v621_v8  ;;  %v635_v14 = vsel %vm287_vm1, %v621_v8, 0 }
  0x98   : > { %2919 = vmatmul.mubr.msk.bf16.vlgmr.msra.gmra.mxu0 %vm283_vm3, %v254_v63 }
  0x99   : > { %527 = vmatpush1.bf16.msra.mxu0 %v504_v7  ;;  %544 = vmatprep.mubr.bf16.mxu0 %v3160_v6 }
  0x9a   : > { %2926 = vmatprep.subr.msk.bf16.mxu0 %vm287_vm1, %v624_v9  ;;  %v744_v12 = vpop.permute.xlu0 %743  ;;  %v746_v15 = vpop.permute.xlu1 %745 }
  0x9b   : > { %3028 = vmatmul.mubr.msk.bf16.vlgmr.msra.gmra.mxu1 %vm283_vm3, %v2921_v11  ;;  %v749_v18 = vsel %vm747_vm6, %v744_v12, %v746_v15  ;;  %v748_v21 = vsel %vm747_vm6, %v742_v10, %v744_v12  ;;  %v760_v22 = vsel %vm287_vm1, %v746_v15, 0 }
  0x9c   : > { %3032 = vmatpush3.bf16.msra.mxu1 %v635_v14  ;;  %3033 = vmatprep.mubr.msk.bf16.mxu1 %vm3159_vm0, %v3158_v3  ;;  %v754_v24 = vsel %vm287_vm1, %v748_v21, 0 }
  0x9d   : > { %3037 = vmatprep.subr.bf16.mxu1 %v3158_v3 }
  0x9e   : > { %v867_v17 = vpop.permute.xlu0 %866  ;;  %v869_v19 = vpop.permute.xlu1 %868 }
  0x9f   : > { %v873_v29 = vsel %vm872_vm7, %v867_v17, %v869_v19 }
  0xa0   : > { %2923 = vmatmul.mubr.msk.bf16.vlgmr.msra.gmra.mxu0 %vm283_vm3, %v2921_v11  ;;  %v879_v32 = vsel %vm287_vm1, %v873_v29, 0 }
  0xa1   : > { %652 = vmatpush1.bf16.msra.mxu0 %v629_v16  ;;  %669 = vmatprep.mubr.bf16.mxu0 %v3160_v6 }
  0xa2   : > { %2930 = vmatprep.subr.msk.bf16.mxu0 %vm287_vm1, %v749_v18  ;;  %v871_v23 = vpop.permute.xlu0 %870  ;;  %v992_v25 = vpop.permute.xlu1 %991 }
  0xa3   : > { %3034 = vmatmul.mubr.msk.bf16.vlgmr.msra.gmra.mxu1 %vm283_vm3, %v2925_v20  ;;  %v874_v26 = vsel %vm872_vm7, %v869_v19, %v871_v23  ;;  %v885_v30 = vsel %vm287_vm1, %v871_v23, 0 }
  0xa4   : > { %3038 = vmatpush3.bf16.msra.mxu1 %v760_v22  ;;  %3039 = vmatprep.mubr.msk.bf16.mxu1 %vm3159_vm0, %v3158_v3 }
  0xa5   : > { %3043 = vmatprep.subr.bf16.mxu1 %v3158_v3 }
  0xa6   : > { %v994_v27 = vpop.permute.xlu0 %993  ;;  %v996_v31 = vpop.permute.xlu1 %995 }
  0xa7   : > { %v999_v34 = vsel %vm997_vm8, %v994_v27, %v996_v31  ;;  %v998_v37 = vsel %vm997_vm8, %v992_v25, %v994_v27  ;;  %v1010_v38 = vsel %vm287_vm1, %v996_v31, 0 }
  0xa8   : > { %2927 = vmatmul.mubr.msk.bf16.vlgmr.msra.gmra.mxu0 %vm283_vm3, %v2925_v20  ;;  %v1004_v40 = vsel %vm287_vm1, %v998_v37, 0 }
  0xa9   : > { %777 = vmatpush1.bf16.msra.mxu0 %v754_v24  ;;  %794 = vmatprep.mubr.bf16.mxu0 %v3160_v6 }
  0xaa   : > { %2934 = vmatprep.subr.msk.bf16.mxu0 %vm287_vm1, %v874_v26  ;;  %v1117_v33 = vpop.permute.xlu0 %1116  ;;  %v1119_v35 = vpop.permute.xlu1 %1118 }
  0xab   : > { %3040 = vmatmul.mubr.msk.bf16.vlgmr.msra.gmra.mxu1 %vm283_vm3, %v2929_v28  ;;  %v1123_v44 = vsel %vm1122_vm9, %v1117_v33, %v1119_v35 }
  0xac   : > { %3044 = vmatpush3.bf16.msra.mxu1 %v885_v30  ;;  %3045 = vmatprep.mubr.msk.bf16.mxu1 %vm3159_vm0, %v3158_v3  ;;  %v1129_v48 = vsel %vm287_vm1, %v1123_v44, 0 }
  0xad   : > { %3049 = vmatprep.subr.bf16.mxu1 %v3158_v3 }
  0xae   : > { %v1121_v39 = vpop.permute.xlu0 %1120  ;;  %v1242_v41 = vpop.permute.xlu1 %1241 }
  0xaf   : > { %v1124_v42 = vsel %vm1122_vm9, %v1119_v35, %v1121_v39  ;;  %v1135_v45 = vsel %vm287_vm1, %v1121_v39, 0 }
  0xb0   : > { %2931 = vmatmul.mubr.msk.bf16.vlgmr.msra.gmra.mxu0 %vm283_vm3, %v2929_v28 }
  0xb1   : > { %902 = vmatpush1.bf16.msra.mxu0 %v879_v32  ;;  %919 = vmatprep.mubr.bf16.mxu0 %v3160_v6 }
  0xb2   : > { %2938 = vmatprep.subr.msk.bf16.mxu0 %vm287_vm1, %v999_v34  ;;  %v1244_v46 = vpop.permute.xlu0 %1243  ;;  %v1246_v47 = vpop.permute.xlu1 %1245 }
  0xb3   : > { %3046 = vmatmul.mubr.msk.bf16.vlgmr.msra.gmra.mxu1 %vm283_vm3, %v2933_v36  ;;  %v1249_v49 = vsel %vm1247_vm10, %v1244_v46, %v1246_v47  ;;  %v1248_v51 = vsel %vm1247_vm10, %v1242_v41, %v1244_v46  ;;  %v1260_v52 = vsel %vm287_vm1, %v1246_v47, 0 }
  0xb4   : > { %3050 = vmatpush3.bf16.msra.mxu1 %v1010_v38  ;;  %3051 = vmatprep.mubr.msk.bf16.mxu1 %vm3159_vm0, %v3158_v3  ;;  %v1254_v53 = vsel %vm287_vm1, %v1248_v51, 0 }
  0xb5   : > { %3055 = vmatprep.subr.bf16.mxu1 %v3158_v3 }
  0xb8   : > { %2935 = vmatmul.mubr.msk.bf16.vlgmr.msra.gmra.mxu0 %vm283_vm3, %v2933_v36 }
  0xb9   : > { %1027 = vmatpush1.bf16.msra.mxu0 %v1004_v40  ;;  %1044 = vmatprep.mubr.bf16.mxu0 %v3160_v6 }
  0xba   : > { %2942 = vmatprep.subr.msk.bf16.mxu0 %vm287_vm1, %v1124_v42 }
  0xbb   : > { %3052 = vmatmul.mubr.msk.bf16.vlgmr.msra.gmra.mxu1 %vm283_vm3, %v2937_v43 }
  0xbc   : > { %3056 = vmatpush3.bf16.msra.mxu1 %v1135_v45  ;;  %3057 = vmatprep.mubr.msk.bf16.mxu1 %vm3159_vm0, %v3158_v3 }
  0xbd   : > { %3061 = vmatprep.subr.bf16.mxu1 %v3158_v3 }
  0xc0   : > { %2939 = vmatmul.mubr.msk.bf16.vlgmr.msra.gmra.mxu0 %vm283_vm3, %v2937_v43 }
  0xc1   : > { %1152 = vmatpush1.bf16.msra.mxu0 %v1129_v48  ;;  %1169 = vmatprep.mubr.bf16.mxu0 %v3160_v6 }
  0xc2   : > { %2946 = vmatprep.subr.msk.bf16.mxu0 %vm287_vm1, %v1249_v49  ;;  %vm1890_vm1 = vcmask 7168  }
  0xc3   : > { %3058 = vmatmul.mubr.msk.bf16.vlgmr.msra.gmra.mxu1 %vm283_vm3, %v2941_v50 }
  0xc4   : > { %3062 = vmatpush3.bf16.msra.mxu1 %v1260_v52  ;;  %3063 = vmatprep.mubr.msk.bf16.mxu1 %vm3159_vm0, %v3158_v3 }
  0xc5   : > { %3067 = vmatprep.subr.mxu1 %v3158_v3 }
  0xc8   : > { %2943 = vmatmul.mubr.msk.bf16.vlgmr.msra.gmra.mxu0 %vm283_vm3, %v2941_v50 }
  0xc9   : > { %1277 = vmatpush1.bf16.msra.mxu0 %v1254_v53  ;;  %1294 = vmatprep.mubr.bf16.mxu0 %v3160_v6 }
  0xcb   : > { %3064 = vmatmul.mubr.msk.bf16.vlgmr.msra.gmra.mxu1 %vm283_vm3, %v2945_v54 }
  0xcc   : > { %3069 = vmatprep.mubr.msk.f32.mxu1 %vm3159_vm0, %v3158_v3 }
  0xd0   : > { %2947 = vmatmul.mubr.msk.bf16.vlgmr.msra.gmra.mxu0 %vm283_vm3, %v2945_v54  ;;  %vm2362_vm3 = vcmask 908288  }
  0xd1   : > { %1480 = vmatprep.mubr.f32.mxu0 %v3158_v3 }
 0x14b   : > { %v372_v6 = vpop.f32.mrf.mxu1 }
 0x14d   : > { %v3017_v55 = vpop.f32.mrf.mxu1 }
 0x14f   : > { %v375_v57 = vpop.f32.mrf.mxu1 }
 0x150   : > { %v331_v56 = vpop.f32.mrf.mxu0 }
 0x151   : > { %v3018_v59 = vpop.f32.mrf.mxu1 }
 0x152   : > { %v333_v58 = vpop.f32.mrf.mxu0 }
 0x153   : > { %v465_v61 = vpop.f32.mrf.mxu1 }
 0x154   : > { %v335_v60 = vpop.f32.mrf.mxu0  ;;  %v466_v44 = vadd.f32 %v465_v61, %v372_v6 }
 0x155   : > { %v3023_v63 = vpop.f32.mrf.mxu1 }
 0x156   : > { %v336_v62 = vpop.f32.mrf.mxu0 }
 0x157   : > { %v468_v1 = vpop.f32.mrf.mxu1 }
 0x158   : > { %v424_v0 = vpop.f32.mrf.mxu0 }
 0x159   : > { %v3024_v5 = vpop.f32.mrf.mxu1  ;;  %v425_v42 = vadd.f32 %v424_v0, %v331_v56 }
 0x15a   : > { %v426_v2 = vpop.f32.mrf.mxu0 }
 0x15b   : > { %v587_v8 = vpop.f32.mrf.mxu1  ;;  %v427_v46 = vadd.f32 %v426_v2, %v333_v58 }
 0x15c   : > { %v428_v7 = vpop.f32.mrf.mxu0  ;;  %v595_v48 = vadd.f32 %v587_v8, %v466_v44  ;;  %v2837_v44 = vld [vmem:[%s3569_s4] sm:$0xff] }
 0x15d   : > { %v3029_v10 = vpop.f32.mrf.mxu1 }
 0x15e   : > { %v429_v9 = vpop.f32.mrf.mxu0  ;;  %v1370_v10 = vsub.s32 2, %v3222_v4 }
 0x15f   : > { %v590_v12 = vpop.f32.mrf.mxu1 }
 0x160   : > { %v546_v11 = vpop.f32.mrf.mxu0 }
 0x161   : > { %v3030_v14 = vpop.f32.mrf.mxu1  ;;  %v593_v50 = vadd.f32 %v546_v11, %v425_v42 }
 0x162   : > { %v548_v13 = vpop.f32.mrf.mxu0  ;;  %v1358_v14 = vld [vmem:[%s3570_s5] sm:$0x7] }
 0x163   : > { %v712_v16 = vpop.f32.mrf.mxu1  ;;  %v594_v54 = vadd.f32 %v548_v13, %v427_v46 }
 0x164   : > { %v550_v15 = vpop.f32.mrf.mxu0  ;;  %v720_v52 = vadd.f32 %v712_v16, %v595_v48 }
 0x165   : > { %v3035_v18 = vpop.f32.mrf.mxu1  ;;  %v1350_v15 = vpop.permute.xlu0 %1349 }
 0x166   : > { %v551_v17 = vpop.f32.mrf.mxu0 }
 0x167   : > { %v715_v20 = vpop.f32.mrf.mxu1 }
 0x168   : > { %v671_v19 = vpop.f32.mrf.mxu0 }
 0x169   : > { %v3036_v22 = vpop.f32.mrf.mxu1  ;;  %v718_v60 = vadd.f32 %v671_v19, %v593_v50 }
 0x16a   : > { %v673_v21 = vpop.f32.mrf.mxu0  ;;  %v1371_v22 = vrot.slane %v1358_v14, %v1370_v10 }
 0x16b   : > { %v837_v24 = vpop.f32.mrf.mxu1  ;;  %v719_v56 = vadd.f32 %v673_v21, %v594_v54  ;;  %v1362_v21 = vsub.s32 0, %v3222_v4 }
 0x16c   : > { %v675_v23 = vpop.f32.mrf.mxu0  ;;  %v845_v57 = vadd.f32 %v837_v24, %v720_v52 }
 0x16d   : > { %v3041_v26 = vpop.f32.mrf.mxu1 }
 0x16e   : > { %v676_v25 = vpop.f32.mrf.mxu0 }
 0x16f   : > { %v840_v28 = vpop.f32.mrf.mxu1 }
 0x170   : > { %v796_v27 = vpop.f32.mrf.mxu0  ;;  %v1366_v28 = vsub.s32 1, %v3222_v4 }
 0x171   : > { %v3042_v30 = vpop.f32.mrf.mxu1  ;;  %v843_v0 = vadd.f32 %v796_v27, %v718_v60  ;;  %v2949_v60 = vld [vmem:[%s3568_s3 + $0x8] sm:$0xff] }
 0x172   : > { %v798_v29 = vpop.f32.mrf.mxu0 }
 0x173   : > { %v962_v32 = vpop.f32.mrf.mxu1  ;;  %v844_v2 = vadd.f32 %v798_v29, %v719_v56 }
 0x174   : > { %v800_v31 = vpop.f32.mrf.mxu0  ;;  %v970_v63 = vadd.f32 %v962_v32, %v845_v57  ;;  %v1363_v32 = vrot.slane %v1358_v14, %v1362_v21 }
 0x175   : > { %v3047_v34 = vpop.f32.mrf.mxu1 }
 0x176   : > { %v801_v33 = vpop.f32.mrf.mxu0 }
 0x177   : > { %v965_v36 = vpop.f32.mrf.mxu1 }
 0x178   : > { %v921_v35 = vpop.f32.mrf.mxu0 }
 0x179   : > { %v3048_v38 = vpop.f32.mrf.mxu1  ;;  %v968_v5 = vadd.f32 %v921_v35, %v843_v0 }
 0x17a   : > { %v923_v37 = vpop.f32.mrf.mxu0 }
 0x17b   : > { %v1087_v40 = vpop.f32.mrf.mxu1  ;;  %v969_v11 = vadd.f32 %v923_v37, %v844_v2 }
 0x17c   : > { %v925_v39 = vpop.f32.mrf.mxu0  ;;  %v1095_v61 = vadd.f32 %v1087_v40, %v970_v63 }
 0x17d   : > { %v3053_v43 = vpop.f32.mrf.mxu1  ;;  %v1367_v39 = vrot.slane %v1358_v14, %v1366_v28  ;;  %v2966_v28 = vld [vmem:[%s3568_s3 + $0x30] sm:$0xff] }
 0x17e   : > { %v926_v41 = vpop.f32.mrf.mxu0 }
 0x17f   : > { %v1090_v47 = vpop.f32.mrf.mxu1 }
 0x180   : > { %v1046_v45 = vpop.f32.mrf.mxu0 }
 0x181   : > { %v3054_v51 = vpop.f32.mrf.mxu1  ;;  %v1093_v12 = vadd.f32 %v1046_v45, %v968_v5  ;;  %v1398_v45 = vpop.permute.xlu0 %1397 }
 0x182   : > { %v1048_v49 = vpop.f32.mrf.mxu0 }
 0x183   : > { %v1212_v55 = vpop.f32.mrf.mxu1  ;;  %v1094_v18 = vadd.f32 %v1048_v49, %v969_v11 }
 0x184   : > { %v1050_v53 = vpop.f32.mrf.mxu0  ;;  %v1220_v8 = vadd.f32 %v1212_v55, %v1095_v61 }
 0x185   : > { %v3059_v62 = vpop.f32.mrf.mxu1  ;;  %v1558_v46 = vpop.permute.xlu0 %1557 }
 0x186   : > { %v1051_v59 = vpop.f32.mrf.mxu0 }
 0x187   : > { %v1215_v6 = vpop.f32.mrf.mxu1 }
 0x188   : > { %v1171_v1 = vpop.f32.mrf.mxu0  ;;  %v1390_v6 = vld [vmem:[%s3568_s3] sm:$0xff] }
 0x189   : > { %v3060_v7 = vpop.f32.mrf.mxu1  ;;  %v1218_v19 = vadd.f32 %v1171_v1, %v1093_v12  ;;  %v1719_v47 = vpop.permute.xlu0 %1718 }
 0x18a   : > { %v1173_v58 = vpop.f32.mrf.mxu0 }
 0x18b   : > { %v1337_v13 = vpop.f32.mrf.mxu1  ;;  %v1219_v25 = vadd.f32 %v1173_v58, %v1094_v18 }
 0x18c   : > { %v1175_v9 = vpop.f32.mrf.mxu0  ;;  %v1345_v16 = vadd.f32 %v1337_v13, %v1220_v8  ;;  %v2954_v8 = vld [vmem:[%s3568_s3 + $0x10] sm:$0xff]  ;;  %v2957_v13 = vld [vmem:[%s3568_s3 + $0x18] sm:$0xff] }
 0x18d   : > { %v3065_v20 = vpop.f32.mrf.mxu1  ;;  %v1883_v48 = vpop.permute.xlu0 %1882 }
 0x18e   : > { %v1176_v17 = vpop.f32.mrf.mxu0  ;;  %v1354_v23 = vadd.f32 %v1350_v15, %v1345_v16  ;;  %v2960_v20 = vld [vmem:[%s3568_s3 + $0x20] sm:$0xff] }
 0x18f   : > { %v1340_v27 = vpop.f32.mrf.mxu1 }
 0x190   : > { %v1296_v24 = vpop.f32.mrf.mxu0  ;;  %v1357_v29 = vmax.f32 %v1354_v23, 0.0 }
 0x191   : > { %v1343_v26 = vadd.f32 %v1296_v24, %v1218_v19  ;;  %v3066_v34 = vpop.f32.mrf.mxu1  ;;  %v2963_v24 = vld [vmem:[%s3568_s3 + $0x28] sm:$0xff] }
 0x192   : > { %v1298_v30 = vpop.f32.mrf.mxu0  ;;  %v1377_v35 = vmul.f32 %v1371_v22, %v1357_v29 }
 0x193   : > { %v1352_v31 = vadd.f32 %v1350_v15, %v1343_v26  ;;  %v1344_v33 = vadd.f32 %v1298_v30, %v1219_v25 }
 0x194   : > { %v1300_v36 = vpop.f32.mrf.mxu0  ;;  %1385 = vst.msk [vmem:[#allocation2 + $0x18] sm:$0xff] %vm1384_vm11, %v1377_v35 }
 0x195   : > { %v1355_v37 = vmax.f32 %v1352_v31, 0.0  ;;  %v1353_v38 = vadd.f32 %v1350_v15, %v1344_v33 }
 0x196   : > { %v1301_v40 = vpop.f32.mrf.mxu0 }
 0x197   : > { %v3416_v41 = vmul.f32 %v1363_v32, %v1355_v37  ;;  %v1356_v42 = vmax.f32 %v1353_v38, 0.0  ;;  %v2969_v32 = vld [vmem:[%s3568_s3 + $0x38] sm:$0xff]  ;;  %v2972_v37 = vld [vmem:[%s3568_s3 + $0x40] sm:$0xff] }
 0x198   : > { %v3148_v38 = vld [vmem:[#allocation2] sm:$0xff] }
 0x199   : > { %v3418_v43 = vmul.f32 %v1367_v39, %v1356_v42  ;;  %1559 = vrot.lane.b32.xlu0 %v3416_v41, %s3170_s13 }
 0x19b   : > { %v3422_v4 = vld [vmem:[#allocation2 + $0x18] sm:$0xff] }
 0x19c   : > { %1403 = vrot.lane.b32.xlu1 %v3422_v4, %s3169_s12 }
 0x19d   : > { %1720 = vrot.lane.b32.xlu0 %v3416_v41, %s3171_s14 }
 0x1a0   : > { %1563 = vrot.lane.b32.xlu1 %v3422_v4, %s3170_s13 }
 0x1a1   : > { %1884 = vrot.lane.b32.xlu0 %v3416_v41, %s3172_s15 }
 0x1a4   : > { %1724 = vrot.lane.b32.xlu1 %v3422_v4, %s3171_s14 }
 0x1a5   : > { %2195 = vrot.lane.b32.xlu0 %v3416_v41, %s3161_s27 }
 0x1a8   : > { %1888 = vrot.lane.b32.xlu1 %v3422_v4, %s3172_s15 }
 0x1a9   : > { %2360 = vrot.lane.b32.xlu0 %v3422_v4, %s3173_s18 }
 0x1ac   : > { %1399 = vrot.lane.b32.xlu1 %v3416_v41, %s3169_s12 }
 0x1ad   : > { %2197 = vrot.lane.b32.xlu0 %v3418_v43, %s3161_s27 }
 0x1b0   : > { %1401 = vrot.lane.b32.xlu1 %v3418_v43, %s3169_s12 }
 0x1b1   : > { %2517 = vrot.lane.b32.xlu0 %v3416_v41, %s3163_s29 }
 0x1b4   : > { %1561 = vrot.lane.b32.xlu1 %v3418_v43, %s3170_s13 }
 0x1b5   : > { %2519 = vrot.lane.b32.xlu0 %v3418_v43, %s3163_s29 }
 0x1b8   : > { %1722 = vrot.lane.b32.xlu1 %v3418_v43, %s3171_s14 }
 0x1b9   : > { %2682 = vrot.lane.b32.xlu0 %v3422_v4, %s3164_s30 }
 0x1bc   : > { %1886 = vrot.lane.b32.xlu1 %v3418_v43, %s3172_s15 }
 0x1bd   : > { %2840 = vperm.xlu0 %3139, %v2837_v44  }
 0x1c0   : > { %2199 = vrot.lane.b32.xlu1 %v3422_v4, %s3161_s27 }
 0x1c4   : > { %2356 = vrot.lane.b32.xlu1 %v3416_v41, %s3173_s18 }
 0x1c8   : > { %2358 = vrot.lane.b32.xlu1 %v3418_v43, %s3173_s18 }
 0x1cc   : > { %2521 = vrot.lane.b32.xlu1 %v3422_v4, %s3163_s29 }
 0x1d0   : > { %2680 = vrot.lane.b32.xlu1 %v3418_v43, %s3164_s30 }
 0x1d4   : > { %2678 = vrot.lane.b32.xlu1 %v3416_v41, %s3164_s30 }
 0x20b   : > { %v1560_v50 = vpop.permute.xlu0 %1559 }
 0x20c   : > { %v1566_v2 = vsel %vm1565_vm14, %v1558_v46, %v1560_v50 }
 0x20e   : > { %v1404_v49 = vpop.permute.xlu1 %1403 }
 0x20f   : > { %v1721_v53 = vpop.permute.xlu0 %1720 }
 0x210   : > { %v1727_v11 = vsel %vm1726_vm15, %v1719_v47, %v1721_v53 }
 0x212   : > { %v1564_v51 = vpop.permute.xlu1 %1563 }
 0x213   : > { %v1885_v55 = vpop.permute.xlu0 %1884 }
 0x214   : > { %v1891_v16 = vsel %vm1890_vm1, %v1883_v48, %v1885_v55 }
 0x216   : > { %v1725_v52 = vpop.permute.xlu1 %1724 }
 0x217   : > { %v3473_v1 = vpop.permute.xlu0 %2195 }
 0x21a   : > { %v1889_v54 = vpop.permute.xlu1 %1888 }
 0x21b   : > { %v2361_v5 = vpop.permute.xlu0 %2360 }
 0x21e   : > { %v1400_v57 = vpop.permute.xlu1 %1399 }
 0x21f   : > { %v1406_v56 = vsel %vm1405_vm12, %v1398_v45, %v1400_v57  ;;  %v2198_v17 = vpop.permute.xlu0 %2197 }
 0x220   : > { %v2202_v23 = vsel %vm280_vm2, %v3473_v1, %v2198_v17 }
 0x222   : > { %v1402_v59 = vpop.permute.xlu1 %1401 }
 0x223   : > { %v1408_v62 = vsel %vm1405_vm12, %v1402_v59, %v1404_v49  ;;  %v1407_v63 = vsel %vm1405_vm12, %v1400_v57, %v1402_v59  ;;  %v2518_v21 = vpop.permute.xlu0 %2517 }
 0x224   : > { %1446 = vmatprep.subr.mxu0 %v1407_v63  ;;  %3068 = vmatpush3.msra.mxu1 %v1408_v62 }
 0x225   : > { %1447 = vmatpush1.msra.mxu0 %v1406_v56  ;;  %3070 = vmatmul.mubr.msk.f32.vlgmr.msra.gmra.mxu1 %vm1412_vm13, %v2949_v60 }
 0x226   : > { %2950 = vmatmul.mubr.msk.f32.vlgmr.msra.gmra.mxu0 %vm1412_vm13, %v2949_v60  ;;  %v1562_v0 = vpop.permute.xlu1 %1561  ;;  %3072 = vmatprep.subr.mxu1 %v3158_v3 }
 0x227   : > { %v1568_v61 = vsel %vm1565_vm14, %v1562_v0, %v1564_v51  ;;  %v1567_v58 = vsel %vm1565_vm14, %v1560_v50, %v1562_v0  ;;  %3074 = vmatprep.mubr.msk.f32.mxu1 %vm3159_vm0, %v3158_v3  ;;  %1639 = vmatprep.mubr.f32.mxu0 %v3158_v3  ;;  %v2520_v29 = vpop.permute.xlu0 %2519 }
 0x228   : > { %1605 = vmatprep.subr.mxu0 %v1567_v58  ;;  %3073 = vmatpush3.msra.mxu1 %v1568_v61  ;;  %v2524_v33 = vsel %vm622_vm5, %v2518_v21, %v2520_v29 }
 0x229   : > { %1606 = vmatpush1.msra.mxu0 %v1566_v2  ;;  %3075 = vmatmul.mubr.msk.f32.vlgmr.msra.gmra.mxu1 %vm1412_vm13, %v1390_v6 }
 0x22a   : > { %2952 = vmatmul.mubr.msk.f32.vlgmr.msra.gmra.mxu0 %vm1412_vm13, %v1390_v6  ;;  %v1723_v7 = vpop.permute.xlu1 %1722  ;;  %3077 = vmatprep.subr.mxu1 %v3158_v3 }
 0x22b   : > { %v1729_v9 = vsel %vm1726_vm15, %v1723_v7, %v1725_v52  ;;  %v1728_v10 = vsel %vm1726_vm15, %v1721_v53, %v1723_v7  ;;  %3079 = vmatprep.mubr.msk.f32.mxu1 %vm3159_vm0, %v3158_v3  ;;  %1800 = vmatprep.mubr.f32.mxu0 %v3158_v3  ;;  %v2683_v34 = vpop.permute.xlu0 %2682 }
 0x22c   : > { %1766 = vmatprep.subr.mxu0 %v1728_v10  ;;  %3078 = vmatpush3.msra.mxu1 %v1729_v9 }
 0x22d   : > { %1767 = vmatpush1.msra.mxu0 %v1727_v11  ;;  %3080 = vmatmul.mubr.msk.f32.vlgmr.msra.gmra.mxu1 %vm1412_vm13, %v2954_v8 }
 0x22e   : > { %2955 = vmatmul.mubr.msk.f32.vlgmr.msra.gmra.mxu0 %vm1412_vm13, %v2954_v8  ;;  %v1887_v12 = vpop.permute.xlu1 %1886  ;;  %3082 = vmatprep.subr.mxu1 %v3158_v3 }
 0x22f   : > { %v1893_v14 = vsel %vm1890_vm1, %v1887_v12, %v1889_v54  ;;  %v1892_v15 = vsel %vm1890_vm1, %v1885_v55, %v1887_v12  ;;  %3084 = vmatprep.mubr.msk.f32.mxu1 %vm3159_vm0, %v3158_v3  ;;  %1964 = vmatprep.mubr.f32.mxu0 %v3158_v3 }
 0x230   : > { %1930 = vmatprep.subr.mxu0 %v1892_v15  ;;  %3083 = vmatpush3.msra.mxu1 %v1893_v14 }
 0x231   : > { %1931 = vmatpush1.msra.mxu0 %v1891_v16  ;;  %3085 = vmatmul.mubr.msk.f32.vlgmr.msra.gmra.mxu1 %vm1412_vm13, %v2957_v13 }
 0x232   : > { %3087 = vmatprep.subr.mxu1 %v3158_v3  ;;  %2958 = vmatmul.mubr.msk.f32.vlgmr.msra.gmra.mxu0 %vm1412_vm13, %v2957_v13  ;;  %v2200_v18 = vpop.permute.xlu1 %2199 }
 0x233   : > { %2079 = vmatprep.subr.mxu0 %v3418_v43  ;;  %3088 = vmatpush3.msra.mxu1 %v3422_v4  ;;  %v2203_v19 = vsel %vm280_vm2, %v2198_v17, %v2200_v18 }
 0x234   : > { %2080 = vmatpush1.msra.mxu0 %v3416_v41  ;;  %3089 = vmatprep.mubr.msk.f32.mxu1 %vm3159_vm0, %v3158_v3 }
 0x235   : > { %2240 = vmatprep.subr.mxu0 %v2203_v19  ;;  %3092 = vmatprep.subr.mxu1 %v3158_v3 }
 0x236   : > { %2113 = vmatprep.mubr.f32.mxu0 %v3158_v3  ;;  %3090 = vmatmul.mubr.msk.f32.vlgmr.msra.gmra.mxu1 %vm1412_vm13, %v2960_v20  ;;  %v2357_v22 = vpop.permute.xlu1 %2356 }
 0x237   : > { %3093 = vmatpush3.msra.mxu1 %v2200_v18  ;;  %2961 = vmatmul.mubr.msk.f32.vlgmr.msra.gmra.mxu0 %vm1412_vm13, %v2960_v20 }
 0x238   : > { %2241 = vmatpush1.msra.mxu0 %v2202_v23  ;;  %3094 = vmatprep.mubr.msk.f32.mxu1 %vm3159_vm0, %v3158_v3 }
 0x239   : > { %3097 = vmatprep.subr.mxu1 %v3158_v3  ;;  %2274 = vmatprep.mubr.f32.mxu0 %v3158_v3 }
 0x23a   : > { %3095 = vmatmul.mubr.msk.f32.vlgmr.msra.gmra.mxu1 %vm1412_vm13, %v2963_v24  ;;  %v2359_v25 = vpop.permute.xlu1 %2358 }
 0x23b   : > { %3098 = vmatpush3.msra.mxu1 %v2361_v5  ;;  %2964 = vmatmul.mubr.msk.f32.vlgmr.msra.gmra.mxu0 %vm1412_vm13, %v2963_v24  ;;  %v2363_v26 = vsel %vm2362_vm3, %v2357_v22, %v2359_v25  ;;  %v2364_v27 = vsel %vm2362_vm3, %v2359_v25, %v2361_v5 }
 0x23c   : > { %2401 = vmatprep.subr.mxu0 %v2364_v27  ;;  %3099 = vmatprep.mubr.msk.f32.mxu1 %vm3159_vm0, %v3158_v3 }
 0x23d   : > { %2402 = vmatpush1.msra.mxu0 %v2363_v26  ;;  %2435 = vmatprep.mubr.f32.mxu0 %v3158_v3 }
 0x23e   : > { %3100 = vmatmul.mubr.msk.f32.vlgmr.msra.gmra.mxu1 %vm1412_vm13, %v2966_v28  ;;  %3102 = vmatprep.subr.mxu1 %v3158_v3  ;;  %v2522_v30 = vpop.permute.xlu1 %2521 }
 0x23f   : > { %2967 = vmatmul.mubr.msk.f32.vlgmr.msra.gmra.mxu0 %vm1412_vm13, %v2966_v28  ;;  %3103 = vmatpush3.msra.mxu1 %v2522_v30  ;;  %v2525_v31 = vsel %vm622_vm5, %v2520_v29, %v2522_v30  ;;  %v2841_v29 = vpop.permute.xlu0 %2840 }
 0x240   : > { %2562 = vmatprep.subr.mxu0 %v2525_v31  ;;  %3104 = vmatprep.mubr.msk.f32.mxu1 %vm3159_vm0, %v3158_v3 }
 0x241   : > { %3107 = vmatprep.subr.mxu1 %v3158_v3  ;;  %2563 = vmatpush1.msra.mxu0 %v2524_v33 }
 0x242   : > { %2596 = vmatprep.mubr.f32.mxu0 %v3158_v3  ;;  %3105 = vmatmul.mubr.msk.f32.vlgmr.msra.gmra.mxu1 %vm1412_vm13, %v2969_v32  ;;  %v2681_v35 = vpop.permute.xlu1 %2680 }
 0x243   : > { %3108 = vmatpush3.msra.mxu1 %v2683_v34  ;;  %2970 = vmatmul.mubr.msk.f32.vlgmr.msra.gmra.mxu0 %vm1412_vm13, %v2969_v32  ;;  %v2686_v36 = vsel %vm747_vm6, %v2681_v35, %v2683_v34 }
 0x244   : > { %2723 = vmatprep.subr.mxu0 %v2686_v36  ;;  %3109 = vmatprep.mubr.msk.f32.mxu1 %vm3159_vm0, %v3148_v38 }
 0x245   : > { %2757 = vmatprep.mubr.f32.mxu0 %v3148_v38 }
 0x246   : > { %3110 = vmatmul.mubr.msk.f32.vlgmr.msra.gmra.mxu1 %vm1412_vm13, %v2972_v37  ;;  %v2679_v3 = vpop.permute.xlu1 %2678 }
 0x247   : > { %v2685_v39 = vsel %vm747_vm6, %v2679_v3, %v2681_v35 }
 0x248   : > { %2724 = vmatpush1.msra.mxu0 %v2685_v39 }
 0x249   : > { %2973 = vmatmul.mubr.msk.f32.vlgmr.msra.gmra.mxu0 %vm1412_vm13, %v2972_v37 }
 0x2e5   : > { %v1553_v40 = vpop.f32.mrf.mxu1 }
 0x2e6   : > { %v1482_v41 = vpop.f32.mrf.mxu0 }
 0x2e7   : > { %v3071_v42 = vpop.f32.mrf.mxu1 }
 0x2e8   : > { %v1484_v43 = vpop.f32.mrf.mxu0 }
 0x2e9   : > { %v1712_v4 = vpop.f32.mrf.mxu1 }
 0x2ea   : > { %v1641_v44 = vpop.f32.mrf.mxu0  ;;  %v1713_v57 = vadd.f32 %v1712_v4, %v1553_v40 }
 0x2eb   : > { %v3076_v45 = vpop.f32.mrf.mxu1  ;;  %v1642_v0 = vadd.f32 %v1641_v44, %v1482_v41 }
 0x2ec   : > { %v1643_v46 = vpop.f32.mrf.mxu0 }
 0x2ed   : > { %v1873_v47 = vpop.f32.mrf.mxu1  ;;  %v1644_v2 = vadd.f32 %v1643_v46, %v1484_v43 }
 0x2ee   : > { %v1802_v48 = vpop.f32.mrf.mxu0  ;;  %v1879_v1 = vadd.f32 %v1873_v47, %v1713_v57 }
 0x2ef   : > { %v3081_v49 = vpop.f32.mrf.mxu1  ;;  %v1877_v5 = vadd.f32 %v1802_v48, %v1642_v0 }
 0x2f0   : > { %v1804_v50 = vpop.f32.mrf.mxu0 }
 0x2f1   : > { %v2037_v51 = vpop.f32.mrf.mxu1  ;;  %v1878_v10 = vadd.f32 %v1804_v50, %v1644_v2 }
 0x2f2   : > { %v1966_v52 = vpop.f32.mrf.mxu0  ;;  %v2043_v61 = vadd.f32 %v2037_v51, %v1879_v1 }
 0x2f3   : > { %v3086_v53 = vpop.f32.mrf.mxu1  ;;  %v2041_v11 = vadd.f32 %v1966_v52, %v1877_v5 }
 0x2f4   : > { %v1968_v54 = vpop.f32.mrf.mxu0 }
 0x2f5   : > { %v2042_v15 = vadd.f32 %v1968_v54, %v1878_v10 }
 0x2f6   : > { %v2186_v55 = vpop.f32.mrf.mxu1 }
 0x2f7   : > { %v2115_v59 = vpop.f32.mrf.mxu0  ;;  %v2192_v8 = vadd.f32 %v2186_v55, %v2043_v61 }
 0x2f8   : > { %v3091_v60 = vpop.f32.mrf.mxu1  ;;  %v2190_v16 = vadd.f32 %v2115_v59, %v2041_v11 }
 0x2f9   : > { %v2117_v62 = vpop.f32.mrf.mxu0 }
 0x2fa   : > { %v2347_v63 = vpop.f32.mrf.mxu1  ;;  %v2191_v20 = vadd.f32 %v2117_v62, %v2042_v15 }
 0x2fb   : > { %v2276_v56 = vpop.f32.mrf.mxu0  ;;  %v2353_v13 = vadd.f32 %v2347_v63, %v2192_v8 }
 0x2fc   : > { %v3096_v6 = vpop.f32.mrf.mxu1  ;;  %v2351_v21 = vadd.f32 %v2276_v56, %v2190_v16 }
 0x2fd   : > { %v2278_v58 = vpop.f32.mrf.mxu0 }
 0x2fe   : > { %v2508_v7 = vpop.f32.mrf.mxu1  ;;  %v2352_v24 = vadd.f32 %v2278_v58, %v2191_v20 }
 0x2ff   : > { %v2437_v9 = vpop.f32.mrf.mxu0  ;;  %v2514_v18 = vadd.f32 %v2508_v7, %v2353_v13 }
 0x300   : > { %v3101_v12 = vpop.f32.mrf.mxu1  ;;  %v2512_v25 = vadd.f32 %v2437_v9, %v2351_v21 }
 0x301   : > { %v2439_v14 = vpop.f32.mrf.mxu0 }
 0x302   : > { %v2669_v17 = vpop.f32.mrf.mxu1  ;;  %v2513_v30 = vadd.f32 %v2439_v14, %v2352_v24 }
 0x303   : > { %v2598_v19 = vpop.f32.mrf.mxu0  ;;  %v2675_v23 = vadd.f32 %v2669_v17, %v2514_v18 }
 0x304   : > { %v3106_v22 = vpop.f32.mrf.mxu1  ;;  %v2673_v31 = vadd.f32 %v2598_v19, %v2512_v25 }
 0x305   : > { %v2600_v27 = vpop.f32.mrf.mxu0 }
 0x306   : > { %v2830_v26 = vpop.f32.mrf.mxu1  ;;  %v2674_v35 = vadd.f32 %v2600_v27, %v2513_v30 }
 0x307   : > { %v2836_v28 = vadd.f32 %v2830_v26, %v2675_v23 }
 0x308   : > { %v3111_v32 = vpop.f32.mrf.mxu1 }
 0x309   : > { %v2845_v33 = vadd.f32 %v2841_v29, %v2836_v28  ;;  %v2759_v34 = vpop.f32.mrf.mxu0 }
 0x30a   : > { %v2834_v36 = vadd.f32 %v2759_v34, %v2673_v31 }
 0x30b   : > { %v2848_v37 = vmax.f32 %v2845_v33, 0.0  ;;  %v2761_v38 = vpop.f32.mrf.mxu0 }
 0x30c   : > { %v2843_v3 = vadd.f32 %v2841_v29, %v2834_v36  ;;  %v2835_v39 = vadd.f32 %v2761_v38, %v2674_v35 }
 0x30d   : > { %2851 = vst.msk [vmem:[%s251_s20 + $0x10] sm:$0xff] %vm1384_vm11, %v2848_v37 }
 0x30e   : > { %v2846_v40 = vmax.f32 %v2843_v3, 0.0  ;;  %v2844_v41 = vadd.f32 %v2841_v29, %v2835_v39 }
 0x310   : > { %2849 = vst [vmem:[%s251_s20] sm:$0xff] %v2846_v40  ;;  %v2847_v42 = vmax.f32 %v2844_v41, 0.0 }
 0x312   : > { %2850 = vst [vmem:[%s251_s20 + $0x8] sm:$0xff] %v2847_v42 }
 0x313 PF: > { %s16_s21 = sadd.s32 1, %s3155_s21  }
 0x314   : > { %p13_p4 = scmp.ge.s32.totalorder %s16_s21, 4  }
 0x316   :  { %15 = sbr.rel (!%p13_p4) target bundleno = 1 (0x1), region = 90 }

</bundles_post_ra>
